<compile_context>
chip_gen: v7x
topology: tpu7x:2x2x1
jax: 0.10.0
libtpu: 0.0.40
codegen_flags: <defaults>
</compile_context>

<pallas_src>
import functools

import numpy as np
import jax
import jax.numpy as jnp
from jax.experimental import pallas as pl
from jax.experimental.pallas import tpu as pltpu

FEAT_DIM = 64     # encoder.fc.in_features of the synthetic base_model stem
HIDDEN = 2048     # projector hidden width (fixed by SimCLR.__init__)
OUT_DIM = 128     # out_dim


def _round_up(x, m):
    return ((x + m - 1) // m) * m


def _vmem_estimate(tb, hw, kp):
    """Rough per-step VMEM footprint (bytes) for batch-tile size `tb`."""
    lane = 128
    kp_lanes = _round_up(max(kp, lane), lane)
    x_tile = tb * hw * kp_lanes * 2                # bf16 im2col tile (lane-padded)
    y_act = tb * hw * lane * 4                     # f32 conv activations (64->128)
    weights = (kp_lanes * FEAT_DIM + FEAT_DIM * HIDDEN + HIDDEN * OUT_DIM) * 2
    small = tb * (HIDDEN + 2 * lane) * 4
    return 2 * x_tile + y_act + 2 * weights + small + (2 << 20)


def _pick_tile_batch(batch, hw, kp):
    """Images per grid step: whole batch if tiny, else the largest 8-aligned
    tile that divides the batch, fits a v7x-safe VMEM budget and (preferably)
    leaves >= 2 grid steps for pipelining / TensorCore sharding."""
    if batch <= 8:
        return batch
    budget = 40 * 1024 * 1024
    fitting = [tb for tb in (256, 128, 64, 32, 16, 8)
               if batch % tb == 0 and _vmem_estimate(tb, hw, kp) <= budget]
    if not fitting:
        return 8 if batch % 8 == 0 else batch
    for tb in fitting:                      # largest first
        if batch // tb >= 2:
            return tb
    return fitting[0]


# --------------------------- fused SimCLR kernel ----------------------------
def _simclr_kernel(x_ref, wc_ref, bc_ref, w1_ref, b1_ref, w2_ref, b2_ref,
                   z_ref, *, tb, hw):
    # x_ref:  (TB*HW, K_PAD) bf16  im2col patches (tap-major, channel-minor)
    # wc_ref: (K_PAD, FEAT)  bf16  fused conv weight;  bc_ref: (1, FEAT) f32 bias
    # w1/b1/w2/b2: projector weights (bf16) / biases (f32)
    # z_ref:  (TB, OUT_DIM) f32 lane-dense output block

    # Conv2d(C, FEAT, 3, s=1, p=1) == one K=9*C matmul on the MXU (f32 acc),
    # over valid output positions only.
    y = jnp.dot(x_ref[...], wc_ref[...], preferred_element_type=jnp.float32)
    y = jnp.maximum(y + bc_ref[...], 0.0)                    # (TB*HW, FEAT) f32

    # Global average pool: per-image f32 mean over the HW valid rows
    # (sublane reduce; free filler under an MXU-bound kernel).
    h = jnp.mean(y.reshape(tb, hw, FEAT_DIM), axis=1)        # (TB, FEAT) f32

    # Projector: Linear(FEAT, 2048) -> ReLU -> Linear(2048, OUT_DIM).
    a = jnp.dot(h.astype(jnp.bfloat16), w1_ref[...],
                preferred_element_type=jnp.float32) + b1_ref[...]
    a = jnp.maximum(a, 0.0)
    z_ref[...] = jnp.dot(a.astype(jnp.bfloat16), w2_ref[...],
                         preferred_element_type=jnp.float32) + b2_ref[...]


# ------------------------------ forward wrapper ------------------------------
def simclr_forward(x, params):
    B, C, H, W = x.shape
    HW = H * W
    K = 9 * C
    K_PAD = max(32, _round_up(K, 8))
    TB = _pick_tile_batch(B, HW, K_PAD)
    NB = B // TB
    assert TB * NB == B

    # Glue (XLA): im2col to a lane-dense, K-last layout.  At CIFAR scale the
    # ~10x element expansion is a few MB per grid step; it buys one fused
    # K=9*C conv matmul per tile with a fully contiguous input DMA.
    xn = jnp.transpose(x, (0, 2, 3, 1))                       # NHWC
    xp = jnp.pad(xn, ((0, 0), (1, 1), (1, 1), (0, 0)))
    cols = [xp[:, di:di + H, dj:dj + W, :]
            for di in range(3) for dj in range(3)]
    patches = jnp.stack(cols, axis=3).reshape(B, HW, K)       # tap-major, C-minor
    patches = jnp.pad(patches, ((0, 0), (0, 0), (0, K_PAD - K)))
    x_col = patches.reshape(B * HW, K_PAD).astype(jnp.bfloat16)

    # Conv weight (out, in, kh, kw) -> (9*C, FEAT), K padded to match x_col.
    wf = jnp.transpose(params["w_conv"], (2, 3, 1, 0)).reshape(K, FEAT_DIM)
    wc = jnp.pad(wf, ((0, K_PAD - K), (0, 0))).astype(jnp.bfloat16)
    bc = params["b_conv"].reshape(1, FEAT_DIM).astype(jnp.float32)

    w1 = params["w1"].astype(jnp.bfloat16)
    b1 = params["b1"].reshape(1, HIDDEN).astype(jnp.float32)
    w2 = params["w2"].astype(jnp.bfloat16)
    b2 = params["b2"].reshape(1, OUT_DIM).astype(jnp.float32)

    kernel = functools.partial(_simclr_kernel, tb=TB, hw=HW)
    vmem_limit = int(min(48 * 1024 * 1024,
                         max(32 * 1024 * 1024, _vmem_estimate(TB, HW, K_PAD))))

    return pl.pallas_call(
        kernel,
        out_shape=jax.ShapeDtypeStruct((B, OUT_DIM), jnp.float32),
        grid_spec=pltpu.PrefetchScalarGridSpec(
            num_scalar_prefetch=0,
            grid=(NB,),
            in_specs=[
                # Per-tile im2col block: lane-dense, contiguous HBM rows.
                pl.BlockSpec((TB * HW, K_PAD), lambda g: (g, 0)),
                # Constant-index operands stay resident across grid steps.
                pl.BlockSpec((K_PAD, FEAT_DIM), lambda g: (0, 0)),
                pl.BlockSpec((1, FEAT_DIM), lambda g: (0, 0)),
                pl.BlockSpec((FEAT_DIM, HIDDEN), lambda g: (0, 0)),
                pl.BlockSpec((1, HIDDEN), lambda g: (0, 0)),
                pl.BlockSpec((HIDDEN, OUT_DIM), lambda g: (0, 0)),
                pl.BlockSpec((1, OUT_DIM), lambda g: (0, 0)),
            ],
            out_specs=pl.BlockSpec((TB, OUT_DIM), lambda g: (g, 0)),
        ),
        compiler_params=pltpu.CompilerParams(
            dimension_semantics=("parallel",),
            vmem_limit_bytes=vmem_limit),
    )(x_col, wc, bc, w1, b1, w2, b2)


# ------------------------------ params / reference ---------------------------
def init_params(key, in_channels):
    k = jax.random.split(key, 6)
    scale_conv = 1.0 / jnp.sqrt(in_channels * 9.0)
    scale_w1 = 1.0 / jnp.sqrt(float(FEAT_DIM))
    scale_w2 = 1.0 / jnp.sqrt(float(HIDDEN))
    return {
        # synthetic encoder conv stem (PyTorch weight layout: out, in, kh, kw)
        "w_conv": jax.random.normal(k[0], (FEAT_DIM, in_channels, 3, 3),
                                    jnp.float32) * scale_conv,
        "b_conv": jax.random.normal(k[1], (FEAT_DIM,), jnp.float32) * scale_conv,
        # projector: Linear(FEAT_DIM, 2048) -> ReLU -> Linear(2048, OUT_DIM)
        "w1": jax.random.normal(k[2], (FEAT_DIM, HIDDEN), jnp.float32) * scale_w1,
        "b1": jax.random.normal(k[3], (1, HIDDEN), jnp.float32) * scale_w1,
        "w2": jax.random.normal(k[4], (HIDDEN, OUT_DIM), jnp.float32) * scale_w2,
        "b2": jax.random.normal(k[5], (1, OUT_DIM), jnp.float32) * scale_w2,
    }


def _reference_forward(x, params):
    """Pure-JAX f32 reference (im2col conv + ReLU + GAP + projector MLP)."""
    B, C, H, W = x.shape
    xn = jnp.transpose(x, (0, 2, 3, 1))
    xpad = jnp.pad(xn, ((0, 0), (1, 1), (1, 1), (0, 0)))
    cols = [xpad[:, di:di + H, dj:dj + W, :]
            for di in range(3) for dj in range(3)]
    patches = jnp.stack(cols, axis=3).reshape(B, H * W, 9 * C)
    wf = jnp.transpose(params["w_conv"], (2, 3, 1, 0)).reshape(9 * C, FEAT_DIM)
    y = jnp.maximum(patches @ wf + params["b_conv"][None, None, :], 0.0)
    h = jnp.mean(y, axis=1)
    a = jnp.maximum(h @ params["w1"] + params["b1"], 0.0)
    return a @ params["w2"] + params["b2"]


# ------------------------------------ main -----------------------------------
if __name__ == "__main__":
    key = jax.random.PRNGKey(0)
    kx, kp = jax.random.split(key)

    B, C, H, W = 2, 3, 16, 16                      # small CIFAR10-like input
    x = jax.random.normal(kx, (B, C, H, W), jnp.float32)
    params = init_params(kp, C)

    z = jax.jit(simclr_forward)(x, params)
    jax.block_until_ready(z)

    assert z.shape == (B, OUT_DIM) and z.dtype == jnp.float32
    assert bool(jnp.all(jnp.isfinite(z)))

    # Loose tolerance: kernel uses bf16 MXU inputs with f32 accumulation.
    z_ref = _reference_forward(x, params)
    max_err = float(jnp.max(jnp.abs(z - z_ref)))
    tol = 5e-2 * (1.0 + float(jnp.max(jnp.abs(z_ref))))
    assert max_err < tol, f"max abs error {max_err} exceeds {tol}"

    print("KERNEL_OK")
</pallas_src>

<mosaic_0001>
module attributes {stable_mosaic.version = 11 : i64} {
  func.func @_simclr_kernel(%arg0: i32, %arg1: memref<512x32xbf16, #tpu.memory_space<vmem>>, %arg2: memref<32x64xbf16, #tpu.memory_space<vmem>>, %arg3: memref<1x64xf32, #tpu.memory_space<vmem>>, %arg4: memref<64x2048xbf16, #tpu.memory_space<vmem>>, %arg5: memref<1x2048xf32, #tpu.memory_space<vmem>>, %arg6: memref<2048x128xbf16, #tpu.memory_space<vmem>>, %arg7: memref<1x128xf32, #tpu.memory_space<vmem>>, %arg8: memref<2x128xf32, #tpu.memory_space<vmem>>) attributes {dimension_semantics = [#tpu.dimension_semantics<parallel>], iteration_bounds = array<i64: 1>, scalar_prefetch = 0 : i64, scratch_operands = 0 : i64, tpu.core_type = #tpu.core_type<tc>, window_params = [{transform_indices = @transform_0, window_bounds = array<i64: 512, 32>}, {pipeline_mode = #tpu.pipeline_mode<synchronous>, transform_indices = @transform_1, window_bounds = array<i64: 32, 64>}, {pipeline_mode = #tpu.pipeline_mode<synchronous>, transform_indices = @transform_2, window_bounds = array<i64: 1, 64>}, {pipeline_mode = #tpu.pipeline_mode<synchronous>, transform_indices = @transform_3, window_bounds = array<i64: 64, 2048>}, {pipeline_mode = #tpu.pipeline_mode<synchronous>, transform_indices = @transform_4, window_bounds = array<i64: 1, 2048>}, {pipeline_mode = #tpu.pipeline_mode<synchronous>, transform_indices = @transform_5, window_bounds = array<i64: 2048, 128>}, {pipeline_mode = #tpu.pipeline_mode<synchronous>, transform_indices = @transform_6, window_bounds = array<i64: 1, 128>}, {transform_indices = @transform_7, window_bounds = array<i64: 2, 128>}]} {
    %c0 = arith.constant 0 : index
    %c0_0 = arith.constant 0 : index
    %0 = vector.load %arg1[%c0, %c0_0] : memref<512x32xbf16, #tpu.memory_space<vmem>>, vector<512x32xbf16>
    %c0_1 = arith.constant 0 : index
    %c0_2 = arith.constant 0 : index
    %1 = vector.load %arg2[%c0_1, %c0_2] : memref<32x64xbf16, #tpu.memory_space<vmem>>, vector<32x64xbf16>
    %cst = arith.constant dense<0.000000e+00> : vector<512x64xf32>
    %2 = tpu.matmul %0, %1, %cst {dimension_numbers = #tpu.dot_dimension_numbers<[1], [0], [0], [1], [0, 0, 1, 1], [], []>} : vector<512x32xbf16>, vector<32x64xbf16>, vector<512x64xf32> -> vector<512x64xf32>
    %c0_3 = arith.constant 0 : index
    %c0_4 = arith.constant 0 : index
    %3 = vector.load %arg3[%c0_3, %c0_4] : memref<1x64xf32, #tpu.memory_space<vmem>>, vector<1x64xf32>
    %4 = vector.broadcast %3 : vector<1x64xf32> to vector<512x64xf32>
    %5 = arith.addf %2, %4 : vector<512x64xf32>
    %cst_5 = arith.constant 0.000000e+00 : f32
    %6 = vector.broadcast %cst_5 : f32 to vector<512x64xf32>
    %7 = arith.maximumf %5, %6 : vector<512x64xf32>
    %8 = vector.shape_cast %7 : vector<512x64xf32> to vector<2x256x64xf32>
    %cst_6 = arith.constant dense<0.000000e+00> : vector<2x64xf32>
    %9 = vector.multi_reduction <add>, %8, %cst_6 [1] : vector<2x256x64xf32> to vector<2x64xf32>
    %cst_7 = arith.constant 2.560000e+02 : f32
    %10 = vector.broadcast %cst_7 : f32 to vector<2x64xf32>
    %11 = arith.divf %9, %10 : vector<2x64xf32>
    %12 = arith.truncf %11 : vector<2x64xf32> to vector<2x64xbf16>
    %c0_8 = arith.constant 0 : index
    %c0_9 = arith.constant 0 : index
    %13 = vector.load %arg4[%c0_8, %c0_9] : memref<64x2048xbf16, #tpu.memory_space<vmem>>, vector<64x2048xbf16>
    %cst_10 = arith.constant dense<0.000000e+00> : vector<2x2048xf32>
    %14 = tpu.matmul %12, %13, %cst_10 {dimension_numbers = #tpu.dot_dimension_numbers<[1], [0], [0], [1], [0, 0, 1, 1], [], []>} : vector<2x64xbf16>, vector<64x2048xbf16>, vector<2x2048xf32> -> vector<2x2048xf32>
    %c0_11 = arith.constant 0 : index
    %c0_12 = arith.constant 0 : index
    %15 = vector.load %arg5[%c0_11, %c0_12] : memref<1x2048xf32, #tpu.memory_space<vmem>>, vector<1x2048xf32>
    %16 = vector.broadcast %15 : vector<1x2048xf32> to vector<2x2048xf32>
    %17 = arith.addf %14, %16 : vector<2x2048xf32>
    %cst_13 = arith.constant 0.000000e+00 : f32
    %18 = vector.broadcast %cst_13 : f32 to vector<2x2048xf32>
    %19 = arith.maximumf %17, %18 : vector<2x2048xf32>
    %20 = arith.truncf %19 : vector<2x2048xf32> to vector<2x2048xbf16>
    %c0_14 = arith.constant 0 : index
    %c0_15 = arith.constant 0 : index
    %21 = vector.load %arg6[%c0_14, %c0_15] : memref<2048x128xbf16, #tpu.memory_space<vmem>>, vector<2048x128xbf16>
    %cst_16 = arith.constant dense<0.000000e+00> : vector<2x128xf32>
    %22 = tpu.matmul %20, %21, %cst_16 {dimension_numbers = #tpu.dot_dimension_numbers<[1], [0], [0], [1], [0, 0, 1, 1], [], []>} : vector<2x2048xbf16>, vector<2048x128xbf16>, vector<2x128xf32> -> vector<2x128xf32>
    %c0_17 = arith.constant 0 : index
    %c0_18 = arith.constant 0 : index
    %23 = vector.load %arg7[%c0_17, %c0_18] : memref<1x128xf32, #tpu.memory_space<vmem>>, vector<1x128xf32>
    %24 = vector.broadcast %23 : vector<1x128xf32> to vector<2x128xf32>
    %25 = arith.addf %22, %24 : vector<2x128xf32>
    %c0_19 = arith.constant 0 : index
    %c0_20 = arith.constant 0 : index
    %26 = vector.load %arg8[%c0_19, %c0_20] : memref<2x128xf32, #tpu.memory_space<vmem>>, vector<2x128xf32>
    tpu.vector_store %arg8[%c0_19, %c0_20], %25 {strides = array<i32>} : memref<2x128xf32, #tpu.memory_space<vmem>>, vector<2x128xf32>,
    return
  }
  func.func @transform_0(%arg0: i32) -> (i32, i32) {
    %c0_i32 = arith.constant 0 : i32
    %c0_i32_0 = arith.constant 0 : i32
    return %arg0, %c0_i32 : i32, i32
  }
  func.func @transform_1(%arg0: i32) -> (i32, i32) {
    %c0_i32 = arith.constant 0 : i32
    %c0_i32_0 = arith.constant 0 : i32
    %c0_i32_1 = arith.constant 0 : i32
    return %c0_i32, %c0_i32_0 : i32, i32
  }
  func.func @transform_2(%arg0: i32) -> (i32, i32) {
    %c0_i32 = arith.constant 0 : i32
    %c0_i32_0 = arith.constant 0 : i32
    %c0_i32_1 = arith.constant 0 : i32
    return %c0_i32, %c0_i32_0 : i32, i32
  }
  func.func @transform_3(%arg0: i32) -> (i32, i32) {
    %c0_i32 = arith.constant 0 : i32
    %c0_i32_0 = arith.constant 0 : i32
    %c0_i32_1 = arith.constant 0 : i32
    return %c0_i32, %c0_i32_0 : i32, i32
  }
  func.func @transform_4(%arg0: i32) -> (i32, i32) {
    %c0_i32 = arith.constant 0 : i32
    %c0_i32_0 = arith.constant 0 : i32
    %c0_i32_1 = arith.constant 0 : i32
    return %c0_i32, %c0_i32_0 : i32, i32
  }
  func.func @transform_5(%arg0: i32) -> (i32, i32) {
    %c0_i32 = arith.constant 0 : i32
    %c0_i32_0 = arith.constant 0 : i32
    %c0_i32_1 = arith.constant 0 : i32
    return %c0_i32, %c0_i32_0 : i32, i32
  }
  func.func @transform_6(%arg0: i32) -> (i32, i32) {
    %c0_i32 = arith.constant 0 : i32
    %c0_i32_0 = arith.constant 0 : i32
    %c0_i32_1 = arith.constant 0 : i32
    return %c0_i32, %c0_i32_0 : i32, i32
  }
  func.func @transform_7(%arg0: i32) -> (i32, i32) {
    %c0_i32 = arith.constant 0 : i32
    %c0_i32_0 = arith.constant 0 : i32
    return %arg0, %c0_i32 : i32, i32
  }
}

</mosaic_0001>

<bundles_post_ra>
// kernel: simclr_forward.1
= control target key start
LH: loop header
LB: loop body
LE: loop exit
PB: predicated region body
PF: predicated region fallthrough
CT: control target
= control target key end

     0   :  { %vm275_vm0 = vcmask 261120   ;;  %s4816_s0 = inlined_call_operand.vmem [shape: bf16[512,32], index: 0, kind: input, shape index: {}]   ;;  %s4817_s1 = inlined_call_operand.vmem [shape: bf16[32,64], index: 1, kind: input, shape index: {}]   ;;  %s4818_s2 = inlined_call_operand.vmem [shape: f32[1,64], index: 2, kind: input, shape index: {}]   ;;  %s4819_s3 = inlined_call_operand.vmem [shape: bf16[64,2048], index: 3, kind: input, shape index: {}]   ;;  %s4820_s4 = inlined_call_operand.vmem [shape: f32[1,2048], index: 4, kind: input, shape index: {}]   ;;  %s4821_s5 = inlined_call_operand.vmem [shape: bf16[2048,128], index: 5, kind: input, shape index: {}]   ;;  %s4822_s6 = inlined_call_operand.vmem [shape: f32[1,128], index: 6, kind: input, shape index: {}]   ;;  %s4823_s7 = inlined_call_operand.hbm [shape: f32[2,128], index: 7, kind: output, shape index: {}]  }
   0x1   :  { %v3621_v0 = vld [vmem:[%s4817_s1] sm:$0xff]   ;;  %v3622_v1 = vld [vmem:[%s4817_s1 + $0x8] sm:$0xff]   ;;  %v3625_v4 = vld [vmem:[%s4816_s0 + $0x10] sm:$0xff]  }
   0x2   :  { %3551 = vmatprep.subr.bf16.mxu0 %v3621_v0  ;;  %v3623_v2 = vld [vmem:[%s4816_s0] sm:$0xff]   ;;  %v3624_v3 = vld [vmem:[%s4816_s0 + $0x8] sm:$0xff]   ;;  %v3626_v5 = vld [vmem:[%s4816_s0 + $0x18] sm:$0xff]  }
   0x3   :  { %3552 = vmatpush3.bf16.msra.mxu0 %v3621_v0  ;;  %3555 = vmatprep.mubr.msk.bf16.mxu0 %vm275_vm0, %v3623_v2  ;;  %v3627_v6 = vld [vmem:[%s4816_s0 + $0x20] sm:$0xff]   ;;  %v3628_v7 = vld [vmem:[%s4816_s0 + $0x28] sm:$0xff]   ;;  %v3629_v8 = vld [vmem:[%s4816_s0 + $0x30] sm:$0xff]  }
   0x4   :  { %3553 = vmatprep.subr.bf16.mxu0 %v3622_v1  ;;  %v3630_v9 = vld [vmem:[%s4816_s0 + $0x38] sm:$0xff]   ;;  %v3631_v10 = vld [vmem:[%s4816_s0 + $0x40] sm:$0xff]   ;;  %v3632_v11 = vld [vmem:[%s4816_s0 + $0x48] sm:$0xff]  }
   0x5   :  { %v3633_v12 = vld [vmem:[%s4816_s0 + $0x50] sm:$0xff]   ;;  %v3634_v13 = vld [vmem:[%s4816_s0 + $0x58] sm:$0xff]   ;;  %v3635_v14 = vld [vmem:[%s4816_s0 + $0x60] sm:$0xff]  }
   0x6   :  { %v3636_v15 = vld [vmem:[%s4816_s0 + $0x68] sm:$0xff]   ;;  %v3637_v16 = vld [vmem:[%s4816_s0 + $0x70] sm:$0xff]   ;;  %v3638_v17 = vld [vmem:[%s4816_s0 + $0x78] sm:$0xff]  }
   0x7   :  { %3554 = vmatpush3.bf16.msra.mxu0 %v3622_v1  ;;  %v3639_v18 = vld [vmem:[%s4816_s0 + $0x80] sm:$0xff]   ;;  %v3640_v19 = vld [vmem:[%s4816_s0 + $0x88] sm:$0xff]   ;;  %v3641_v20 = vld [vmem:[%s4816_s0 + $0x90] sm:$0xff]  }
   0x8   :  { %v3642_v21 = vld [vmem:[%s4816_s0 + $0x98] sm:$0xff]   ;;  %v3643_v22 = vld [vmem:[%s4816_s0 + $0xa0] sm:$0xff]   ;;  %v3644_v23 = vld [vmem:[%s4816_s0 + $0xa8] sm:$0xff]  }
   0x9   :  { %v3645_v24 = vld [vmem:[%s4816_s0 + $0xb0] sm:$0xff]   ;;  %v3646_v25 = vld [vmem:[%s4816_s0 + $0xb8] sm:$0xff]   ;;  %v3647_v26 = vld [vmem:[%s4816_s0 + $0xc0] sm:$0xff]  }
   0xa   :  { %3556 = vmatmul.mubr.msk.bf16.vlgmr.msra.gmra.mrb[0].mxu0 %vm275_vm0, %v3624_v3  ;;  %v3648_v27 = vld [vmem:[%s4816_s0 + $0xc8] sm:$0xff]   ;;  %v3649_v28 = vld [vmem:[%s4816_s0 + $0xd0] sm:$0xff]   ;;  %v3650_v29 = vld [vmem:[%s4816_s0 + $0xd8] sm:$0xff]  }
   0xb   :  { %3559 = vmatprep.mubr.msk.bf16.mxu0 %vm275_vm0, %v3625_v4  ;;  %v3651_v30 = vld [vmem:[%s4816_s0 + $0xe0] sm:$0xff]   ;;  %v3652_v31 = vld [vmem:[%s4816_s0 + $0xe8] sm:$0xff]   ;;  %v3653_v32 = vld [vmem:[%s4816_s0 + $0xf0] sm:$0xff]  }
  0x12   :  { %3560 = vmatmul.mubr.msk.bf16.gmra.mrb[4].mxu0 %vm275_vm0, %v3626_v5 }
  0x13   :  { %3563 = vmatprep.mubr.msk.bf16.mxu0 %vm275_vm0, %v3627_v6 }
  0x1a   :  { %3564 = vmatmul.mubr.msk.bf16.gmra.mrb[8].mxu0 %vm275_vm0, %v3628_v7 }
  0x1b   :  { %3567 = vmatprep.mubr.msk.bf16.mxu0 %vm275_vm0, %v3629_v8 }
  0x22   :  { %3568 = vmatmul.mubr.msk.bf16.gmra.mrb[12].mxu0 %vm275_vm0, %v3630_v9 }
  0x23   :  { %3571 = vmatprep.mubr.msk.bf16.mxu0 %vm275_vm0, %v3631_v10 }
  0x2a   :  { %3572 = vmatmul.mubr.msk.bf16.gmra.mrb[16].mxu0 %vm275_vm0, %v3632_v11 }
  0x2b   :  { %3575 = vmatprep.mubr.msk.bf16.mxu0 %vm275_vm0, %v3633_v12 }
  0x32   :  { %3576 = vmatmul.mubr.msk.bf16.gmra.mrb[20].mxu0 %vm275_vm0, %v3634_v13 }
  0x33   :  { %3579 = vmatprep.mubr.msk.bf16.mxu0 %vm275_vm0, %v3635_v14 }
  0x3a   :  { %3580 = vmatmul.mubr.msk.bf16.gmra.mrb[24].mxu0 %vm275_vm0, %v3636_v15 }
  0x3b   :  { %3583 = vmatprep.mubr.msk.bf16.mxu0 %vm275_vm0, %v3637_v16 }
  0x42   :  { %3584 = vmatmul.mubr.msk.bf16.gmra.mrb[28].mxu0 %vm275_vm0, %v3638_v17 }
  0x43   :  { %3587 = vmatprep.mubr.msk.bf16.mxu0 %vm275_vm0, %v3639_v18 }
  0x4a   :  { %3588 = vmatmul.mubr.msk.bf16.gmra.mrb[32].mxu0 %vm275_vm0, %v3640_v19 }
  0x4b   :  { %3591 = vmatprep.mubr.msk.bf16.mxu0 %vm275_vm0, %v3641_v20 }
  0x52   :  { %3592 = vmatmul.mubr.msk.bf16.gmra.mrb[36].mxu0 %vm275_vm0, %v3642_v21 }
  0x53   :  { %3595 = vmatprep.mubr.msk.bf16.mxu0 %vm275_vm0, %v3643_v22 }
  0x5a   :  { %3596 = vmatmul.mubr.msk.bf16.gmra.mrb[40].mxu0 %vm275_vm0, %v3644_v23 }
  0x5b   :  { %3599 = vmatprep.mubr.msk.bf16.mxu0 %vm275_vm0, %v3645_v24 }
  0x62   :  { %3600 = vmatmul.mubr.msk.bf16.gmra.mrb[44].mxu0 %vm275_vm0, %v3646_v25 }
  0x63   :  { %3603 = vmatprep.mubr.msk.bf16.mxu0 %vm275_vm0, %v3647_v26 }
  0x6a   :  { %3604 = vmatmul.mubr.msk.bf16.gmra.mrb[48].mxu0 %vm275_vm0, %v3648_v27 }
  0x6b   :  { %3607 = vmatprep.mubr.msk.bf16.mxu0 %vm275_vm0, %v3649_v28 }
  0x72   :  { %3608 = vmatmul.mubr.msk.bf16.gmra.mrb[52].mxu0 %vm275_vm0, %v3650_v29 }
  0x73   :  { %3611 = vmatprep.mubr.msk.bf16.mxu0 %vm275_vm0, %v3651_v30 }
  0x74   :  { %12 = vsyncpa [#allocation3], 0  ;;  %v3654_v33 = vld [vmem:[%s4816_s0 + $0xf8] sm:$0xff]   ;;  %v3986_v34 = vld [vmem:[%s4818_s2] ss:$0 sm:$0xff]  ;;  %vm725_vm1 = vcmask 523264  }
  0x75   :  { %v869_v50 = vld [vmem:[%s4819_s3] sm:$0xff]  ;;  %vm1021_vm2 = vcmask 1041409  }
  0x76   :  { %v877_v51 = vld [vmem:[%s4819_s3 + $0x40] sm:$0xff] }
  0x77   :  { %v3141_v54 = vcombine.high %v869_v50, %v877_v51  ;;  %v3140_v59 = vcombine.low %v869_v50, %v877_v51  ;;  %v885_v2 = vld [vmem:[%s4819_s3 + $0x80] sm:$0xff] }
  0x78   :  { %v893_v3 = vld [vmem:[%s4819_s3 + $0xc0] sm:$0xff] }
  0x79   :  { %1347 = vmatprep.subr.bf16.mxu1 %v3141_v54  ;;  %v3157_v5 = vcombine.high %v885_v2, %v893_v3  ;;  %v3156_v9 = vcombine.low %v885_v2, %v893_v3  ;;  %v901_v14 = vld [vmem:[%s4819_s3 + $0x100] sm:$0xff] }
  0x7a   :  { %3612 = vmatmul.mubr.msk.bf16.gmra.mrb[56].mxu0 %vm275_vm0, %v3652_v31  ;;  %1348 = vmatpush1.bf16.msra.mxu1 %v3140_v59  ;;  %v909_v15 = vld [vmem:[%s4819_s3 + $0x140] sm:$0xff] }
  0x7b   :  { %3615 = vmatprep.mubr.msk.bf16.mxu0 %vm275_vm0, %v3653_v32  ;;  %1349 = vmatprep.subr.bf16.mxu1 %v3157_v5  ;;  %v3173_v19 = vcombine.high %v901_v14, %v909_v15  ;;  %v3172_v23 = vcombine.low %v901_v14, %v909_v15  ;;  %v917_v30 = vld [vmem:[%s4819_s3 + $0x180] sm:$0xff] }
  0x7c   :  { %v925_v31 = vld [vmem:[%s4819_s3 + $0x1c0] sm:$0xff] }
  0x7e   :  { %1350 = vmatpush1.bf16.msra.mxu1 %v3156_v9 }
  0x7f   :  { %1351 = vmatprep.subr.bf16.mxu1 %v3173_v19 }
  0x82   :  { %3616 = vmatmul.mubr.msk.bf16.gmra.mrb[60].mxu0 %vm275_vm0, %v3654_v33  ;;  %1352 = vmatpush1.bf16.msra.mxu1 %v3172_v23 }
  0xdd   :  { %v3557_v35 = vpop.f32.mrb[0].mxu0 }
  0xde   :  { %v406_v36 = vpop.f32.mrb[1].mxu0  ;;  %v415_v37 = vadd.f32 %v3557_v35, %v3986_v34  ;;  %v3189_v35 = vcombine.high %v917_v30, %v925_v31 }
  0xdf   :  { %v407_v38 = vadd.f32 %v3986_v34, %v406_v36  ;;  %v3558_v39 = vpop.f32.mrb[2].mxu0 }
  0xe0   :  { %v409_v40 = vpop.f32.mrb[3].mxu0  ;;  %v418_v42 = vadd.f32 %v3558_v39, %v3986_v34  ;;  %v663_v44 = vmax.f32 %v415_v37, 0.0  ;;  %1353 = vmatprep.subr.bf16.mxu1 %v3189_v35 }
  0xe1   :  { %v661_v41 = vmax.f32 %v407_v38, 0.0  ;;  %v410_v43 = vadd.f32 %v3986_v34, %v409_v40  ;;  %v3188_v38 = vcombine.low %v917_v30, %v925_v31 }
  0xe2   :  { %v664_v47 = vmax.f32 %v418_v42, 0.0  ;;  %v729_v55 = vsel %vm725_vm1, %v663_v44, 0.0  ;;  %v4042_v44 = vld [vmem:[%s4819_s3 + $0x48] sm:$0xff] }
  0xe3   :  { %v662_v45 = vmax.f32 %v410_v43, 0.0  ;;  %v726_v46 = vsel %vm725_vm1, %v661_v41, 0.0  ;;  %1354 = vmatpush1.bf16.msra.mxu1 %v3188_v38  ;;  %v4037_v43 = vld [vmem:[%s4819_s3 + $0x8] sm:$0xff] }
  0xe4   :  { %v731_v62 = vsel %vm725_vm1, %v664_v47, 0.0 }
  0xe5   :  { %v727_v48 = vsel %vm725_vm1, %v662_v45, 0.0  ;;  %v3561_v49 = vpop.f32.mrb[4].mxu0 }
  0xe6   :  { %v728_v52 = vadd.f32 %v727_v48, %v726_v46  ;;  %v422_v53 = vpop.f32.mrb[5].mxu0  ;;  %v431_v56 = vadd.f32 %v3561_v49, %v3986_v34  ;;  %v3143_v48 = vcombine.high %v4037_v43, %v4042_v44 }
  0xe7   :  { %v423_v57 = vadd.f32 %v3986_v34, %v422_v53  ;;  %v3562_v58 = vpop.f32.mrb[6].mxu0 }
  0xe8   :  { %v730_v60 = vadd.f32 %v729_v55, %v728_v52  ;;  %v425_v61 = vpop.f32.mrb[7].mxu0  ;;  %v434_v0 = vadd.f32 %v3562_v58, %v3986_v34  ;;  %v667_v6 = vmax.f32 %v431_v56, 0.0  ;;  %v3142_v52 = vcombine.low %v4037_v43, %v4042_v44  ;;  %1388 = vmatprep.subr.bf16.mxu1 %v3143_v48 }
  0xe9   :  { %v665_v63 = vmax.f32 %v423_v57, 0.0  ;;  %v426_v1 = vadd.f32 %v3986_v34, %v425_v61  ;;  %v3807_v55 = vmov 0  }
  0xea   :  { %v732_v4 = vadd.f32 %v731_v62, %v730_v60  ;;  %v668_v11 = vmax.f32 %v434_v0, 0.0  ;;  %v737_v20 = vsel %vm725_vm1, %v667_v6, 0.0  ;;  %1379 = vmatprep.mubr.bf16.mxu1 %v3807_v55 }
  0xeb   :  { %v733_v7 = vsel %vm725_vm1, %v665_v63, 0.0  ;;  %v666_v8 = vmax.f32 %v426_v1, 0.0 }
  0xec   :  { %v734_v10 = vadd.f32 %v733_v7, %v732_v4  ;;  %v739_v26 = vsel %vm725_vm1, %v668_v11, 0.0 }
  0xed   :  { %v735_v12 = vsel %vm725_vm1, %v666_v8, 0.0  ;;  %v3565_v13 = vpop.f32.mrb[8].mxu0 }
  0xee   :  { %v736_v16 = vadd.f32 %v735_v12, %v734_v10  ;;  %v447_v17 = vadd.f32 %v3565_v13, %v3986_v34  ;;  %v438_v18 = vpop.f32.mrb[9].mxu0 }
  0xef   :  { %v439_v21 = vadd.f32 %v3986_v34, %v438_v18  ;;  %v3566_v22 = vpop.f32.mrb[10].mxu0 }
  0xf0   :  { %v738_v24 = vadd.f32 %v737_v20, %v736_v16  ;;  %v441_v25 = vpop.f32.mrb[11].mxu0  ;;  %v450_v28 = vadd.f32 %v3566_v22, %v3986_v34  ;;  %v671_v32 = vmax.f32 %v447_v17, 0.0 }
  0xf1   :  { %v669_v27 = vmax.f32 %v439_v21, 0.0  ;;  %v442_v29 = vadd.f32 %v3986_v34, %v441_v25 }
  0xf2   :  { %v740_v33 = vadd.f32 %v739_v26, %v738_v24  ;;  %v672_v40 = vmax.f32 %v450_v28, 0.0  ;;  %v745_v45 = vsel %vm725_vm1, %v671_v32, 0.0 }
  0xf3   :  { %v741_v36 = vsel %vm725_vm1, %v669_v27, 0.0  ;;  %v670_v37 = vmax.f32 %v442_v29, 0.0 }
  0xf4   :  { %v742_v39 = vadd.f32 %v741_v36, %v740_v33  ;;  %v747_v56 = vsel %vm725_vm1, %v672_v40, 0.0 }
  0xf5   :  { %v743_v41 = vsel %vm725_vm1, %v670_v37, 0.0  ;;  %v3569_v42 = vpop.f32.mrb[12].mxu0 }
  0xf6   :  { %v744_v46 = vadd.f32 %v743_v41, %v742_v39  ;;  %v454_v47 = vpop.f32.mrb[13].mxu0  ;;  %v463_v49 = vadd.f32 %v3569_v42, %v3986_v34 }
  0xf7   :  { %v455_v50 = vadd.f32 %v3986_v34, %v454_v47  ;;  %v3570_v51 = vpop.f32.mrb[14].mxu0 }
  0xf8   :  { %v746_v53 = vadd.f32 %v745_v45, %v744_v46  ;;  %v457_v54 = vpop.f32.mrb[15].mxu0  ;;  %v466_v58 = vadd.f32 %v3570_v51, %v3986_v34  ;;  %v675_v61 = vmax.f32 %v463_v49, 0.0 }
  0xf9   :  { %v673_v57 = vmax.f32 %v455_v50, 0.0  ;;  %v458_v59 = vadd.f32 %v3986_v34, %v457_v54 }
  0xfa   :  { %v748_v60 = vadd.f32 %v747_v56, %v746_v53  ;;  %v676_v1 = vmax.f32 %v466_v58, 0.0  ;;  %v753_v6 = vsel %vm725_vm1, %v675_v61, 0.0 }
  0xfb   :  { %v749_v62 = vsel %vm725_vm1, %v673_v57, 0.0  ;;  %v674_v63 = vmax.f32 %v458_v59, 0.0 }
  0xfc   :  { %v750_v0 = vadd.f32 %v749_v62, %v748_v60  ;;  %v755_v12 = vsel %vm725_vm1, %v676_v1, 0.0 }
  0xfd   :  { %v751_v2 = vsel %vm725_vm1, %v674_v63, 0.0  ;;  %v3573_v3 = vpop.f32.mrb[16].mxu0 }
  0xfe   :  { %v752_v4 = vadd.f32 %v751_v2, %v750_v0  ;;  %v470_v5 = vpop.f32.mrb[17].mxu0  ;;  %v479_v7 = vadd.f32 %v3573_v3, %v3986_v34 }
  0xff   :  { %v471_v8 = vadd.f32 %v3986_v34, %v470_v5  ;;  %v3574_v9 = vpop.f32.mrb[18].mxu0 }
 0x100   :  { %v754_v10 = vadd.f32 %v753_v6, %v752_v4  ;;  %v473_v11 = vpop.f32.mrb[19].mxu0  ;;  %v482_v14 = vadd.f32 %v3574_v9, %v3986_v34  ;;  %v679_v17 = vmax.f32 %v479_v7, 0.0 }
 0x101   :  { %v677_v13 = vmax.f32 %v471_v8, 0.0  ;;  %v474_v15 = vadd.f32 %v3986_v34, %v473_v11 }
 0x102   :  { %v756_v16 = vadd.f32 %v755_v12, %v754_v10  ;;  %v680_v21 = vmax.f32 %v482_v14, 0.0  ;;  %v761_v26 = vsel %vm725_vm1, %v679_v17, 0.0 }
 0x103   :  { %v757_v18 = vsel %vm725_vm1, %v677_v13, 0.0  ;;  %v678_v19 = vmax.f32 %v474_v15, 0.0 }
 0x104   :  { %v758_v20 = vadd.f32 %v757_v18, %v756_v16  ;;  %v763_v32 = vsel %vm725_vm1, %v680_v21, 0.0 }
 0x105   :  { %v759_v22 = vsel %vm725_vm1, %v678_v19, 0.0  ;;  %v3577_v23 = vpop.f32.mrb[20].mxu0 }
 0x106   :  { %v760_v24 = vadd.f32 %v759_v22, %v758_v20  ;;  %v486_v25 = vpop.f32.mrb[21].mxu0  ;;  %v495_v27 = vadd.f32 %v3577_v23, %v3986_v34 }
 0x107   :  { %v487_v28 = vadd.f32 %v3986_v34, %v486_v25  ;;  %v3578_v29 = vpop.f32.mrb[22].mxu0 }
 0x108   :  { %v762_v30 = vadd.f32 %v761_v26, %v760_v24  ;;  %v489_v31 = vpop.f32.mrb[23].mxu0  ;;  %v498_v35 = vadd.f32 %v3578_v29, %v3986_v34  ;;  %v683_v38 = vmax.f32 %v495_v27, 0.0 }
 0x109   :  { %v681_v33 = vmax.f32 %v487_v28, 0.0  ;;  %v490_v36 = vadd.f32 %v3986_v34, %v489_v31 }
 0x10a   :  { %v764_v37 = vadd.f32 %v763_v32, %v762_v30  ;;  %v684_v42 = vmax.f32 %v498_v35, 0.0  ;;  %v769_v49 = vsel %vm725_vm1, %v683_v38, 0.0 }
 0x10b   :  { %v765_v39 = vsel %vm725_vm1, %v681_v33, 0.0  ;;  %v682_v40 = vmax.f32 %v490_v36, 0.0 }
 0x10c   :  { %v766_v41 = vadd.f32 %v765_v39, %v764_v37  ;;  %v771_v57 = vsel %vm725_vm1, %v684_v42, 0.0 }
 0x10d   :  { %v767_v45 = vsel %vm725_vm1, %v682_v40, 0.0  ;;  %v3581_v46 = vpop.f32.mrb[24].mxu0 }
 0x10e   :  { %v768_v47 = vadd.f32 %v767_v45, %v766_v41  ;;  %v502_v48 = vpop.f32.mrb[25].mxu0  ;;  %v511_v50 = vadd.f32 %v3581_v46, %v3986_v34 }
 0x10f   :  { %v503_v51 = vadd.f32 %v3986_v34, %v502_v48  ;;  %v3582_v53 = vpop.f32.mrb[26].mxu0 }
 0x110   :  { %v770_v54 = vadd.f32 %v769_v49, %v768_v47  ;;  %v505_v56 = vpop.f32.mrb[27].mxu0  ;;  %v514_v59 = vadd.f32 %v3582_v53, %v3986_v34  ;;  %v687_v62 = vmax.f32 %v511_v50, 0.0 }
 0x111   :  { %v685_v58 = vmax.f32 %v503_v51, 0.0  ;;  %v506_v60 = vadd.f32 %v3986_v34, %v505_v56 }
 0x112   :  { %v772_v61 = vadd.f32 %v771_v57, %v770_v54  ;;  %v688_v2 = vmax.f32 %v514_v59, 0.0  ;;  %v777_v7 = vsel %vm725_vm1, %v687_v62, 0.0 }
 0x113   :  { %v773_v63 = vsel %vm725_vm1, %v685_v58, 0.0  ;;  %v686_v0 = vmax.f32 %v506_v60, 0.0 }
 0x114   :  { %v774_v1 = vadd.f32 %v773_v63, %v772_v61  ;;  %v779_v13 = vsel %vm725_vm1, %v688_v2, 0.0 }
 0x115   :  { %v775_v3 = vsel %vm725_vm1, %v686_v0, 0.0  ;;  %v3585_v4 = vpop.f32.mrb[28].mxu0 }
 0x116   :  { %v776_v5 = vadd.f32 %v775_v3, %v774_v1  ;;  %v518_v6 = vpop.f32.mrb[29].mxu0  ;;  %v527_v8 = vadd.f32 %v3585_v4, %v3986_v34 }
 0x117   :  { %v519_v9 = vadd.f32 %v3986_v34, %v518_v6  ;;  %v3586_v10 = vpop.f32.mrb[30].mxu0 }
 0x118   :  { %v778_v11 = vadd.f32 %v777_v7, %v776_v5  ;;  %v521_v12 = vpop.f32.mrb[31].mxu0  ;;  %v530_v15 = vadd.f32 %v3586_v10, %v3986_v34  ;;  %v691_v18 = vmax.f32 %v527_v8, 0.0 }
 0x119   :  { %v689_v14 = vmax.f32 %v519_v9, 0.0  ;;  %v522_v16 = vadd.f32 %v3986_v34, %v521_v12 }
 0x11a   :  { %v780_v17 = vadd.f32 %v779_v13, %v778_v11  ;;  %v692_v22 = vmax.f32 %v530_v15, 0.0  ;;  %v785_v27 = vsel %vm725_vm1, %v691_v18, 0.0 }
 0x11b   :  { %v781_v19 = vsel %vm725_vm1, %v689_v14, 0.0  ;;  %v690_v20 = vmax.f32 %v522_v16, 0.0 }
 0x11c   :  { %v782_v21 = vadd.f32 %v781_v19, %v780_v17  ;;  %v787_v33 = vsel %vm725_vm1, %v692_v22, 0.0 }
 0x11d   :  { %v783_v23 = vsel %vm725_vm1, %v690_v20, 0.0  ;;  %v3589_v24 = vpop.f32.mrb[32].mxu0 }
 0x11e   :  { %v784_v25 = vadd.f32 %v783_v23, %v782_v21  ;;  %v534_v26 = vpop.f32.mrb[33].mxu0  ;;  %v543_v28 = vadd.f32 %v3589_v24, %v3986_v34 }
 0x11f   :  { %v535_v29 = vadd.f32 %v3986_v34, %v534_v26  ;;  %v3590_v30 = vpop.f32.mrb[34].mxu0 }
 0x120   :  { %v786_v31 = vadd.f32 %v785_v27, %v784_v25  ;;  %v537_v32 = vpop.f32.mrb[35].mxu0  ;;  %v546_v36 = vadd.f32 %v3590_v30, %v3986_v34  ;;  %v695_v39 = vmax.f32 %v543_v28, 0.0 }
 0x121   :  { %v693_v35 = vmax.f32 %v535_v29, 0.0  ;;  %v538_v37 = vadd.f32 %v3986_v34, %v537_v32 }
 0x122   :  { %v4095_v38 = vadd.f32 %v787_v33, %v786_v31  ;;  %v696_v42 = vmax.f32 %v546_v36, 0.0  ;;  %v798_v49 = vsel %vm725_vm1, %v695_v39, 0.0 }
 0x123   :  { %v694_v40 = vmax.f32 %v538_v37, 0.0  ;;  %v795_v41 = vsel %vm725_vm1, %v693_v35, 0.0 }
 0x124   :  { %v800_v57 = vsel %vm725_vm1, %v696_v42, 0.0 }
 0x125   :  { %v796_v45 = vsel %vm725_vm1, %v694_v40, 0.0  ;;  %v3593_v46 = vpop.f32.mrb[36].mxu0 }
 0x126   :  { %v797_v47 = vadd.f32 %v796_v45, %v795_v41  ;;  %v550_v48 = vpop.f32.mrb[37].mxu0  ;;  %v559_v50 = vadd.f32 %v3593_v46, %v3986_v34 }
 0x127   :  { %v551_v51 = vadd.f32 %v3986_v34, %v550_v48  ;;  %v3594_v53 = vpop.f32.mrb[38].mxu0 }
 0x128   :  { %v799_v54 = vadd.f32 %v798_v49, %v797_v47  ;;  %v553_v56 = vpop.f32.mrb[39].mxu0  ;;  %v562_v59 = vadd.f32 %v3594_v53, %v3986_v34  ;;  %v699_v62 = vmax.f32 %v559_v50, 0.0 }
 0x129   :  { %v697_v58 = vmax.f32 %v551_v51, 0.0  ;;  %v554_v60 = vadd.f32 %v3986_v34, %v553_v56 }
 0x12a   :  { %v801_v61 = vadd.f32 %v800_v57, %v799_v54  ;;  %v700_v2 = vmax.f32 %v562_v59, 0.0  ;;  %v806_v7 = vsel %vm725_vm1, %v699_v62, 0.0 }
 0x12b   :  { %v802_v63 = vsel %vm725_vm1, %v697_v58, 0.0  ;;  %v698_v0 = vmax.f32 %v554_v60, 0.0 }
 0x12c   :  { %v803_v1 = vadd.f32 %v802_v63, %v801_v61  ;;  %v808_v13 = vsel %vm725_vm1, %v700_v2, 0.0 }
 0x12d   :  { %v804_v3 = vsel %vm725_vm1, %v698_v0, 0.0  ;;  %v3597_v4 = vpop.f32.mrb[40].mxu0 }
 0x12e   :  { %v805_v5 = vadd.f32 %v804_v3, %v803_v1  ;;  %v566_v6 = vpop.f32.mrb[41].mxu0  ;;  %v575_v8 = vadd.f32 %v3597_v4, %v3986_v34 }
 0x12f   :  { %v567_v9 = vadd.f32 %v3986_v34, %v566_v6  ;;  %v3598_v10 = vpop.f32.mrb[42].mxu0 }
 0x130   :  { %v807_v11 = vadd.f32 %v806_v7, %v805_v5  ;;  %v569_v12 = vpop.f32.mrb[43].mxu0  ;;  %v578_v15 = vadd.f32 %v3598_v10, %v3986_v34  ;;  %v703_v18 = vmax.f32 %v575_v8, 0.0 }
 0x131   :  { %v701_v14 = vmax.f32 %v567_v9, 0.0  ;;  %v570_v16 = vadd.f32 %v3986_v34, %v569_v12 }
 0x132   :  { %v809_v17 = vadd.f32 %v808_v13, %v807_v11  ;;  %v704_v22 = vmax.f32 %v578_v15, 0.0  ;;  %v814_v27 = vsel %vm725_vm1, %v703_v18, 0.0 }
 0x133   :  { %v810_v19 = vsel %vm725_vm1, %v701_v14, 0.0  ;;  %v702_v20 = vmax.f32 %v570_v16, 0.0 }
 0x134   :  { %v811_v21 = vadd.f32 %v810_v19, %v809_v17  ;;  %v816_v33 = vsel %vm725_vm1, %v704_v22, 0.0 }
 0x135   :  { %v812_v23 = vsel %vm725_vm1, %v702_v20, 0.0  ;;  %v3601_v24 = vpop.f32.mrb[44].mxu0 }
 0x136   :  { %v813_v25 = vadd.f32 %v812_v23, %v811_v21  ;;  %v582_v26 = vpop.f32.mrb[45].mxu0  ;;  %v591_v28 = vadd.f32 %v3601_v24, %v3986_v34 }
 0x137   :  { %v583_v29 = vadd.f32 %v3986_v34, %v582_v26  ;;  %v3602_v30 = vpop.f32.mrb[46].mxu0 }
 0x138   :  { %v815_v31 = vadd.f32 %v814_v27, %v813_v25  ;;  %v585_v32 = vpop.f32.mrb[47].mxu0  ;;  %v594_v36 = vadd.f32 %v3602_v30, %v3986_v34  ;;  %v707_v40 = vmax.f32 %v591_v28, 0.0 }
 0x139   :  { %v705_v35 = vmax.f32 %v583_v29, 0.0  ;;  %v586_v37 = vadd.f32 %v3986_v34, %v585_v32 }
 0x13a   :  { %v817_v39 = vadd.f32 %v816_v33, %v815_v31  ;;  %v708_v46 = vmax.f32 %v594_v36, 0.0  ;;  %v822_v51 = vsel %vm725_vm1, %v707_v40, 0.0 }
 0x13b   :  { %v818_v41 = vsel %vm725_vm1, %v705_v35, 0.0  ;;  %v706_v42 = vmax.f32 %v586_v37, 0.0 }
 0x13c   :  { %v819_v45 = vadd.f32 %v818_v41, %v817_v39  ;;  %v824_v59 = vsel %vm725_vm1, %v708_v46, 0.0 }
 0x13d   :  { %v820_v47 = vsel %vm725_vm1, %v706_v42, 0.0  ;;  %v3605_v48 = vpop.f32.mrb[48].mxu0 }
 0x13e   :  { %v821_v49 = vadd.f32 %v820_v47, %v819_v45  ;;  %v598_v50 = vpop.f32.mrb[49].mxu0  ;;  %v607_v53 = vadd.f32 %v3605_v48, %v3986_v34  ;;  %v789_v47 = vrot.slane %v4095_v38, 4 }
 0x13f   :  { %v599_v54 = vadd.f32 %v3986_v34, %v598_v50  ;;  %v3606_v56 = vpop.f32.mrb[50].mxu0 }
 0x140   :  { %v823_v57 = vadd.f32 %v822_v51, %v821_v49  ;;  %v601_v58 = vpop.f32.mrb[51].mxu0  ;;  %v610_v61 = vadd.f32 %v3606_v56, %v3986_v34  ;;  %v711_v0 = vmax.f32 %v607_v53, 0.0 }
 0x141   :  { %v709_v60 = vmax.f32 %v599_v54, 0.0  ;;  %v602_v62 = vadd.f32 %v3986_v34, %v601_v58 }
 0x142   :  { %v825_v63 = vadd.f32 %v824_v59, %v823_v57  ;;  %v712_v4 = vmax.f32 %v610_v61, 0.0  ;;  %v830_v9 = vsel %vm725_vm1, %v711_v0, 0.0 }
 0x143   :  { %v826_v1 = vsel %vm725_vm1, %v709_v60, 0.0  ;;  %v710_v2 = vmax.f32 %v602_v62, 0.0  ;;  %v790_v60 = vadd.f32 %v789_v47, %v4095_v38 }
 0x144   :  { %v827_v3 = vadd.f32 %v826_v1, %v825_v63  ;;  %v832_v15 = vsel %vm725_vm1, %v712_v4, 0.0 }
 0x145   :  { %v828_v5 = vsel %vm725_vm1, %v710_v2, 0.0  ;;  %v3609_v6 = vpop.f32.mrb[52].mxu0 }
 0x146   :  { %v829_v7 = vadd.f32 %v828_v5, %v827_v3  ;;  %v614_v8 = vpop.f32.mrb[53].mxu0  ;;  %v623_v10 = vadd.f32 %v3609_v6, %v3986_v34 }
 0x147   :  { %v615_v11 = vadd.f32 %v3986_v34, %v614_v8  ;;  %v3610_v12 = vpop.f32.mrb[54].mxu0 }
 0x148   :  { %v831_v13 = vadd.f32 %v830_v9, %v829_v7  ;;  %v617_v14 = vpop.f32.mrb[55].mxu0  ;;  %v626_v17 = vadd.f32 %v3610_v12, %v3986_v34  ;;  %v715_v20 = vmax.f32 %v623_v10, 0.0  ;;  %v791_v7 = vrot.slane %v790_v60, 2 }
 0x149   :  { %v713_v16 = vmax.f32 %v615_v11, 0.0  ;;  %v618_v18 = vadd.f32 %v3986_v34, %v617_v14 }
 0x14a   :  { %v833_v19 = vadd.f32 %v832_v15, %v831_v13  ;;  %v716_v24 = vmax.f32 %v626_v17, 0.0  ;;  %v838_v29 = vsel %vm725_vm1, %v715_v20, 0.0  ;;  %v792_v12 = vadd.f32 %v791_v7, %v790_v60  ;;  %v879_v60 = vld [vmem:[%s4819_s3 + $0x50] sm:$0xff] }
 0x14b   :  { %v834_v21 = vsel %vm725_vm1, %v713_v16, 0.0  ;;  %v714_v22 = vmax.f32 %v618_v18, 0.0  ;;  %v3656_v16 = vld [vmem:[%s4821_s5] sm:$0xff]   ;;  %v919_v7 = vld [vmem:[%s4819_s3 + $0x190] sm:$0xff] }
 0x14c   :  { %v835_v23 = vadd.f32 %v834_v21, %v833_v19  ;;  %v840_v36 = vsel %vm725_vm1, %v716_v24, 0.0  ;;  %v793_v17 = vrot.slane %v792_v12, 1  ;;  %v3659_v24 = vld [vmem:[%s4821_s5 + $0x50] sm:$0xff]  }
 0x14d   :  { %v836_v25 = vsel %vm725_vm1, %v714_v22, 0.0  ;;  %v3613_v26 = vpop.f32.mrb[56].mxu0  ;;  %v3657_v22 = vld [vmem:[%s4821_s5 + $0x48] sm:$0xff]  }
 0x14e   :  { %v837_v27 = vadd.f32 %v836_v25, %v835_v23  ;;  %v630_v28 = vpop.f32.mrb[57].mxu0  ;;  %v639_v30 = vadd.f32 %v3613_v26, %v3986_v34  ;;  %v794_v20 = vadd.f32 %v793_v17, %v792_v12  ;;  %v3658_v23 = vld [vmem:[%s4821_s5 + $0x8] sm:$0xff]   ;;  %v904_v17 = vld [vmem:[%s4819_s3 + $0x118] sm:$0xff] }
 0x14f   :  { %v631_v31 = vadd.f32 %v3986_v34, %v630_v28  ;;  %v3614_v32 = vpop.f32.mrb[58].mxu0  ;;  %v3660_v28 = vld [vmem:[%s4821_s5 + $0x10] sm:$0xff]  }
 0x150   :  { %v839_v33 = vadd.f32 %v838_v29, %v837_v27  ;;  %v633_v35 = vpop.f32.mrb[59].mxu0  ;;  %v642_v39 = vadd.f32 %v3614_v32, %v3986_v34  ;;  %v719_v42 = vmax.f32 %v639_v30, 0.0  ;;  %v865_v26 = vmul.f32 0.00390625, %v794_v20  ;;  %v3661_v29 = vld [vmem:[%s4821_s5 + $0x58] sm:$0xff]  }
 0x151   :  { %v717_v37 = vmax.f32 %v631_v31, 0.0  ;;  %v634_v40 = vadd.f32 %v3986_v34, %v633_v35  ;;  %v3663_v35 = vld [vmem:[%s4821_s5 + $0x60] sm:$0xff]  }
 0x152   :  { %v841_v41 = vadd.f32 %v840_v36, %v839_v33  ;;  %v720_v49 = vmax.f32 %v642_v39, 0.0  ;;  %v846_v56 = vsel %vm725_vm1, %v719_v42, 0.0  ;;  %v867_v31 = vpack.c.bf16 %v865_v26, %v865_v26  ;;  %v3662_v33 = vld [vmem:[%s4821_s5 + $0x18] sm:$0xff]   ;;  %v3664_v42 = vld [vmem:[%s4821_s5 + $0x20] sm:$0xff]  }
 0x153   :  { %v842_v45 = vsel %vm725_vm1, %v717_v37, 0.0  ;;  %v718_v46 = vmax.f32 %v634_v40, 0.0  ;;  %v886_v40 = vld [vmem:[%s4819_s3 + $0x88] sm:$0xff]  ;;  %v881_v26 = vld [vmem:[%s4819_s3 + $0x60] sm:$0xff] }
 0x154   :  { %v843_v48 = vadd.f32 %v842_v45, %v841_v41  ;;  %v848_v63 = vsel %vm725_vm1, %v720_v49, 0.0  ;;  %v1019_v37 = vunpack.c.l.b16 %v867_v31  ;;  %v894_v41 = vld [vmem:[%s4819_s3 + $0xc8] sm:$0xff] }
 0x155   :  { %v844_v50 = vsel %vm725_vm1, %v718_v46, 0.0  ;;  %v3617_v51 = vpop.f32.mrb[60].mxu0  ;;  %v3665_v45 = vld [vmem:[%s4821_s5 + $0x68] sm:$0xff]  }
 0x156   :  { %v845_v53 = vadd.f32 %v844_v50, %v843_v48  ;;  %v646_v54 = vpop.f32.mrb[61].mxu0  ;;  %v655_v57 = vadd.f32 %v3617_v51, %v3986_v34  ;;  %v3159_v48 = vcombine.high %v886_v40, %v894_v41  ;;  %v902_v49 = vld [vmem:[%s4819_s3 + $0x108] sm:$0xff] }
 0x157   :  { %v647_v58 = vadd.f32 %v3986_v34, %v646_v54  ;;  %v3618_v59 = vpop.f32.mrb[62].mxu0  ;;  %v910_v50 = vld [vmem:[%s4819_s3 + $0x148] sm:$0xff]  ;;  %v3158_v54 = vcombine.low %v886_v40, %v894_v41  ;;  %v929_v40 = vld [vmem:[%s4819_s3 + $0x1e0] sm:$0xff] }
 0x158   :  { %v847_v61 = vadd.f32 %v846_v56, %v845_v53  ;;  %v649_v62 = vpop.f32.mrb[63].mxu0  ;;  %v658_v1 = vadd.f32 %v3618_v59, %v3986_v34  ;;  %v723_v4 = vmax.f32 %v655_v57, 0.0  ;;  %v3666_v51 = vld [vmem:[%s4821_s5 + $0x28] sm:$0xff]   ;;  %v3667_v53 = vld [vmem:[%s4821_s5 + $0x70] sm:$0xff]   ;;  %v3175_v56 = vcombine.high %v902_v49, %v910_v50 }
 0x159   :  { %v721_v0 = vmax.f32 %v647_v58, 0.0  ;;  %v650_v2 = vadd.f32 %v3986_v34, %v649_v62  ;;  %v3655_v34 = vld [vmem:[%s4821_s5 + $0x40] sm:$0xff]   ;;  %v918_v57 = vld [vmem:[%s4819_s3 + $0x188] sm:$0xff]  ;;  %v3668_v59 = vld [vmem:[%s4821_s5 + $0x30] sm:$0xff]   ;;  %v3174_v43 = vcombine.low %v902_v49, %v910_v50 }
 0x15a   :  { %v849_v3 = vadd.f32 %v848_v63, %v847_v61  ;;  %v724_v9 = vmax.f32 %v658_v1, 0.0  ;;  %v854_v11 = vsel %vm725_vm1, %v723_v4, 0.0  ;;  %3375 = vmatprep.subr.bf16.mxu0 %v3655_v34  ;;  %v926_v58 = vld [vmem:[%s4819_s3 + $0x1c8] sm:$0xff]  ;;  %v887_v63 = vld [vmem:[%s4819_s3 + $0x90] sm:$0xff] }
 0x15b   :  { %v850_v5 = vsel %vm725_vm1, %v721_v0, 0.0  ;;  %v722_v6 = vmax.f32 %v650_v2, 0.0  ;;  %3376 = vmatpush3.bf16.msra.mxu0 %v3656_v16  ;;  %v3191_v44 = vcombine.high %v918_v57, %v926_v58  ;;  %v3190_v61 = vcombine.low %v918_v57, %v926_v58  ;;  %v895_v0 = vld [vmem:[%s4819_s3 + $0xd0] sm:$0xff]  ;;  %v890_v50 = vld [vmem:[%s4819_s3 + $0xa8] sm:$0xff] }
 0x15c   :  { %v851_v8 = vadd.f32 %v850_v5, %v849_v3  ;;  %v856_v14 = vsel %vm725_vm1, %v724_v9, 0.0  ;;  %3377 = vmatprep.subr.bf16.mxu0 %v3657_v22  ;;  %v3161_v2 = vcombine.high %v887_v63, %v895_v0  ;;  %v903_v3 = vld [vmem:[%s4819_s3 + $0x110] sm:$0xff]  ;;  %v3160_v5 = vcombine.low %v887_v63, %v895_v0  ;;  %v928_v22 = vld [vmem:[%s4819_s3 + $0x1d8] sm:$0xff]  ;;  %v914_v57 = vld [vmem:[%s4819_s3 + $0x168] sm:$0xff] }
 0x15d   :  { %v852_v10 = vsel %vm725_vm1, %v722_v6, 0.0  ;;  %v911_v4 = vld [vmem:[%s4819_s3 + $0x150] sm:$0xff] }
 0x15e   :  { %v853_v38 = vadd.f32 %v852_v10, %v851_v8  ;;  %v3177_v6 = vcombine.high %v903_v3, %v911_v4  ;;  %v927_v8 = vld [vmem:[%s4819_s3 + $0x1d0] sm:$0xff]  ;;  %v3176_v9 = vcombine.low %v903_v3, %v911_v4 }
 0x15f   :  { %3378 = vmatpush3.bf16.msra.mxu0 %v3658_v23  ;;  %v3193_v10 = vcombine.high %v919_v7, %v927_v8  ;;  %v3192_v12 = vcombine.low %v919_v7, %v927_v8 }
 0x160   :  { %v855_v13 = vadd.f32 %v854_v11, %v853_v38  ;;  %3379 = vmatprep.subr.bf16.mxu0 %v3659_v24  ;;  %v872_v38 = vld [vmem:[%s4819_s3 + $0x18] sm:$0xff] }
 0x161   :  { %v880_v11 = vld [vmem:[%s4819_s3 + $0x58] sm:$0xff] }
 0x162   :  { %v857_v15 = vadd.f32 %v856_v14, %v855_v13  ;;  %v3147_v13 = vcombine.high %v872_v38, %v880_v11  ;;  %v888_v14 = vld [vmem:[%s4819_s3 + $0x98] sm:$0xff]  ;;  %v3146_v34 = vcombine.low %v872_v38, %v880_v11 }
 0x163   :  { %3380 = vmatpush3.bf16.msra.mxu0 %v3660_v28 }
 0x164   :  { %v858_v18 = vrot.slane %v857_v15, 4  ;;  %3381 = vmatprep.subr.bf16.mxu0 %v3661_v29  ;;  %v889_v29 = vld [vmem:[%s4819_s3 + $0xa0] sm:$0xff] }
 0x166   :  { %v859_v19 = vadd.f32 %v858_v18, %v857_v15  ;;  %v896_v15 = vld [vmem:[%s4819_s3 + $0xd8] sm:$0xff] }
 0x167   :  { %3382 = vmatpush3.bf16.msra.mxu0 %v3662_v33  ;;  %v3163_v16 = vcombine.high %v888_v14, %v896_v15  ;;  %v912_v18 = vld [vmem:[%s4819_s3 + $0x158] sm:$0xff]  ;;  %v905_v33 = vld [vmem:[%s4819_s3 + $0x120] sm:$0xff] }
 0x168   :  { %v860_v21 = vrot.slane %v859_v19, 2  ;;  %3383 = vmatprep.subr.bf16.mxu0 %v3663_v35  ;;  %v3179_v20 = vcombine.high %v904_v17, %v912_v18  ;;  %v3178_v23 = vcombine.low %v904_v17, %v912_v18  ;;  %v913_v35 = vld [vmem:[%s4819_s3 + $0x160] sm:$0xff]  ;;  %v892_v18 = vld [vmem:[%s4819_s3 + $0xb8] sm:$0xff] }
 0x169   :  { %v3180_v41 = vcombine.low %v905_v33, %v913_v35  ;;  %v3680_v17 = vld [vmem:[%s4821_s5 + $0x140] sm:$0xff]  }
 0x16a   :  { %v861_v25 = vadd.f32 %v860_v21, %v859_v19  ;;  %v3162_v19 = vcombine.low %v888_v14, %v896_v15  ;;  %v920_v21 = vld [vmem:[%s4819_s3 + $0x198] sm:$0xff] }
 0x16b   :  { %3384 = vmatpush3.bf16.msra.mxu0 %v3664_v42  ;;  %v3195_v24 = vcombine.high %v920_v21, %v928_v22  ;;  %v884_v14 = vld [vmem:[%s4819_s3 + $0x78] sm:$0xff] }
 0x16c   :  { %v862_v27 = vrot.slane %v861_v25, 1  ;;  %3385 = vmatprep.subr.bf16.mxu0 %v3665_v45  ;;  %v874_v45 = vld [vmem:[%s4819_s3 + $0x28] sm:$0xff]  ;;  %v3677_v15 = vld [vmem:[%s4821_s5 + $0x38] sm:$0xff]  }
 0x16e   :  { %v863_v30 = vadd.f32 %v862_v27, %v861_v25  ;;  %v873_v25 = vld [vmem:[%s4819_s3 + $0x20] sm:$0xff]  ;;  %v3194_v27 = vcombine.low %v920_v21, %v928_v22  ;;  %v908_v22 = vld [vmem:[%s4819_s3 + $0x138] sm:$0xff] }
 0x16f   :  { %3386 = vmatpush3.bf16.msra.mxu0 %v3666_v51  ;;  %v3149_v28 = vcombine.high %v873_v25, %v881_v26  ;;  %v3148_v31 = vcombine.low %v873_v25, %v881_v26  ;;  %v898_v51 = vld [vmem:[%s4819_s3 + $0xe8] sm:$0xff]  ;;  %v924_v26 = vld [vmem:[%s4819_s3 + $0x1b8] sm:$0xff] }
 0x170   :  { %v866_v32 = vmul.f32 0.00390625, %v863_v30  ;;  %3387 = vmatprep.subr.bf16.mxu0 %v3667_v53  ;;  %v897_v30 = vld [vmem:[%s4819_s3 + $0xe0] sm:$0xff]  ;;  %v3166_v58 = vcombine.low %v890_v50, %v898_v51 }
 0x172   :  { %v868_v36 = vpack.c.bf16 %v866_v32, %v866_v32  ;;  %v3165_v32 = vcombine.high %v889_v29, %v897_v30 }
 0x173   :  { %3388 = vmatpush3.bf16.msra.mxu0 %v3668_v59 }
 0x174   :  { %v1020_v39 = vunpack.c.l.b16 %v868_v36  ;;  %v3164_v36 = vcombine.low %v889_v29, %v897_v30 }
 0x176   :  { %v1022_v46 = vsel %vm1021_vm2, %v1020_v39, %v1019_v37  ;;  %v3181_v37 = vcombine.high %v905_v33, %v913_v35  ;;  %v921_v39 = vld [vmem:[%s4819_s3 + $0x1a0] sm:$0xff]  ;;  %v3672_v33 = vld [vmem:[%s4821_s5 + $0x88] sm:$0xff]   ;;  %v3673_v35 = vld [vmem:[%s4821_s5 + $0xd0] sm:$0xff]  }
 0x177   :  { %v4198_v47 = vpack.c.b16 %v1022_v46, %v1022_v46  ;;  %v3197_v42 = vcombine.high %v921_v39, %v929_v40  ;;  %v882_v46 = vld [vmem:[%s4819_s3 + $0x68] sm:$0xff] }
 0x178   :  { %v3151_v49 = vcombine.high %v874_v45, %v882_v46  ;;  %v3150_v53 = vcombine.low %v874_v45, %v882_v46  ;;  %v3687_v45 = vld [vmem:[%s4821_s5 + $0xf0] sm:$0xff]  }
 0x179   :  { %3204 = vmatmul.mubr.msk.bf16.vlgmr.msra.gmra.mrb[0].mxu1 %vm725_vm1, %v4198_v47  ;;  %v3689_v46 = vld [vmem:[%s4821_s5 + $0xb0] sm:$0xff]  }
 0x17a   :  { %1389 = vmatpush1.bf16.msra.mxu1 %v3142_v52  ;;  %1420 = vmatprep.mubr.bf16.mxu1 %v3807_v55  ;;  %v871_v52 = vld [vmem:[%s4819_s3 + $0x10] sm:$0xff] }
 0x17b   :  { %1390 = vmatprep.subr.bf16.mxu1 %v3159_v48  ;;  %v3145_v62 = vcombine.high %v871_v52, %v879_v60  ;;  %v3144_v1 = vcombine.low %v871_v52, %v879_v60  ;;  %v3196_v48 = vcombine.low %v921_v39, %v929_v40  ;;  %v3679_v39 = vld [vmem:[%s4821_s5 + $0xe0] sm:$0xff]  }
 0x17c   :  { %v3681_v40 = vld [vmem:[%s4821_s5 + $0xa0] sm:$0xff]  }
 0x17e   :  { %1391 = vmatpush1.bf16.msra.mxu1 %v3158_v54  ;;  %v3167_v54 = vcombine.high %v890_v50, %v898_v51  ;;  %v3696_v50 = vld [vmem:[%s4821_s5 + $0x1c0] sm:$0xff]   ;;  %v937_v51 = vlaneseq }
 0x17f   :  { %1392 = vmatprep.subr.bf16.mxu1 %v3175_v56  ;;  %v906_v56 = vld [vmem:[%s4819_s3 + $0x128] sm:$0xff] }
 0x180   :  { %v3183_v59 = vcombine.high %v906_v56, %v914_v57  ;;  %v3182_v52 = vcombine.low %v906_v56, %v914_v57  ;;  %v4457_v56 = vld [vmem:[%s4820_s4] sm:$0xff] }
 0x182   :  { %1393 = vmatpush1.bf16.msra.mxu1 %v3174_v43  ;;  %v922_v43 = vld [vmem:[%s4819_s3 + $0x1a8] sm:$0xff] }
 0x183   :  { %1394 = vmatprep.subr.bf16.mxu1 %v3191_v44  ;;  %v930_v44 = vld [vmem:[%s4819_s3 + $0x1e8] sm:$0xff] }
 0x184   :  { %v3199_v60 = vcombine.high %v922_v43, %v930_v44  ;;  %v3198_v63 = vcombine.low %v922_v43, %v930_v44 }
 0x186   :  { %1395 = vmatpush1.bf16.msra.mxu1 %v3190_v61  ;;  %v875_v61 = vld [vmem:[%s4819_s3 + $0x30] sm:$0xff] }
 0x187   :  { %1429 = vmatprep.subr.bf16.mxu1 %v3145_v62  ;;  %v883_v62 = vld [vmem:[%s4819_s3 + $0x70] sm:$0xff] }
 0x188   :  { %v3153_v0 = vcombine.high %v875_v61, %v883_v62  ;;  %v3152_v3 = vcombine.low %v875_v61, %v883_v62 }
 0x189   :  { %3205 = vmatmul.mubr.msk.bf16.vlgmr.msra.gmra.mrb[4].mxu1 %vm725_vm1, %v4198_v47 }
 0x18a   :  { %1430 = vmatpush1.bf16.msra.mxu1 %v3144_v1  ;;  %1461 = vmatprep.mubr.bf16.mxu1 %v3807_v55  ;;  %v891_v1 = vld [vmem:[%s4819_s3 + $0xb0] sm:$0xff] }
 0x18b   :  { %1431 = vmatprep.subr.bf16.mxu1 %v3161_v2  ;;  %v899_v2 = vld [vmem:[%s4819_s3 + $0xf0] sm:$0xff] }
 0x18c   :  { %v3169_v4 = vcombine.high %v891_v1, %v899_v2  ;;  %v3168_v7 = vcombine.low %v891_v1, %v899_v2  ;;  %v3682_v2 = vld [vmem:[%s4821_s5 + $0x100] sm:$0xff]  }
 0x18e   :  { %1432 = vmatpush1.bf16.msra.mxu1 %v3160_v5  ;;  %v907_v5 = vld [vmem:[%s4819_s3 + $0x130] sm:$0xff] }
 0x18f   :  { %1433 = vmatprep.subr.bf16.mxu1 %v3177_v6  ;;  %v915_v6 = vld [vmem:[%s4819_s3 + $0x170] sm:$0xff] }
 0x190   :  { %v3185_v8 = vcombine.high %v907_v5, %v915_v6  ;;  %v3184_v38 = vcombine.low %v907_v5, %v915_v6  ;;  %v3686_v6 = vld [vmem:[%s4821_s5 + $0x108] sm:$0xff]  }
 0x192   :  { %1434 = vmatpush1.bf16.msra.mxu1 %v3176_v9  ;;  %v923_v9 = vld [vmem:[%s4819_s3 + $0x1b0] sm:$0xff] }
 0x193   :  { %1435 = vmatprep.subr.bf16.mxu1 %v3193_v10  ;;  %v931_v10 = vld [vmem:[%s4819_s3 + $0x1f0] sm:$0xff] }
 0x194   :  { %v3201_v11 = vcombine.high %v923_v9, %v931_v10 }
 0x196   :  { %1436 = vmatpush1.bf16.msra.mxu1 %v3192_v12  ;;  %v3675_v12 = vld [vmem:[%s4821_s5 + $0x78] sm:$0xff]  }
 0x197   :  { %1470 = vmatprep.subr.bf16.mxu1 %v3147_v13  ;;  %v876_v13 = vld [vmem:[%s4819_s3 + $0x38] sm:$0xff]  ;;  %3389 = vmatprep.subr.bf16.mxu0 %v3675_v12 }
 0x198   :  { %3390 = vmatpush3.bf16.msra.mxu0 %v3677_v15 }
 0x199   :  { %3206 = vmatmul.mubr.msk.bf16.vlgmr.msra.gmra.mrb[8].mxu1 %vm725_vm1, %v4198_v47  ;;  %3419 = vmatprep.subr.bf16.mxu0 %v3680_v17 }
 0x19a   :  { %1471 = vmatpush1.bf16.msra.mxu1 %v3146_v34  ;;  %1502 = vmatprep.mubr.bf16.mxu1 %v3807_v55  ;;  %v3200_v34 = vcombine.low %v923_v9, %v931_v10 }
 0x19b   :  { %1472 = vmatprep.subr.bf16.mxu1 %v3163_v16  ;;  %v3155_v16 = vcombine.high %v876_v13, %v884_v14 }
 0x19e   :  { %1473 = vmatpush1.bf16.msra.mxu1 %v3162_v19  ;;  %v900_v19 = vld [vmem:[%s4819_s3 + $0xf8] sm:$0xff] }
 0x19f   :  { %1474 = vmatprep.subr.bf16.mxu1 %v3179_v20  ;;  %v3154_v20 = vcombine.low %v876_v13, %v884_v14  ;;  %v3171_v21 = vcombine.high %v892_v18, %v900_v19 }
 0x1a2   :  { %1475 = vmatpush1.bf16.msra.mxu1 %v3178_v23  ;;  %v916_v23 = vld [vmem:[%s4819_s3 + $0x178] sm:$0xff] }
 0x1a3   :  { %1476 = vmatprep.subr.bf16.mxu1 %v3195_v24  ;;  %v3170_v24 = vcombine.low %v892_v18, %v900_v19  ;;  %v3187_v25 = vcombine.high %v908_v22, %v916_v23  ;;  %v3695_v19 = vld [vmem:[%s4821_s5 + $0x160] sm:$0xff]  }
 0x1a6   :  { %1477 = vmatpush1.bf16.msra.mxu1 %v3194_v27  ;;  %v932_v27 = vld [vmem:[%s4819_s3 + $0x1f8] sm:$0xff] }
 0x1a7   :  { %1511 = vmatprep.subr.bf16.mxu1 %v3149_v28  ;;  %v3186_v28 = vcombine.low %v908_v22, %v916_v23  ;;  %v3203_v29 = vcombine.high %v924_v26, %v932_v27  ;;  %v3202_v30 = vcombine.low %v924_v26, %v932_v27  ;;  %v3697_v22 = vld [vmem:[%s4821_s5 + $0x120] sm:$0xff]   ;;  %v3700_v26 = vld [vmem:[%s4821_s5 + $0x1c8] sm:$0xff]  }
 0x1a8   :  { %v3698_v23 = vld [vmem:[%s4821_s5 + $0x180] sm:$0xff]  }
 0x1a9   :  { %3207 = vmatmul.mubr.msk.bf16.vlgmr.msra.gmra.mrb[12].mxu1 %vm725_vm1, %v4198_v47 }
 0x1aa   :  { %1512 = vmatpush1.bf16.msra.mxu1 %v3148_v31  ;;  %1543 = vmatprep.mubr.bf16.mxu1 %v3807_v55  ;;  %v3670_v31 = vld [vmem:[%s4821_s5 + $0x80] sm:$0xff]  }
 0x1ab   :  { %1513 = vmatprep.subr.bf16.mxu1 %v3165_v32  ;;  %v3671_v32 = vld [vmem:[%s4821_s5 + $0xc8] sm:$0xff]  }
 0x1ae   :  { %1514 = vmatpush1.bf16.msra.mxu1 %v3164_v36  ;;  %v3674_v36 = vld [vmem:[%s4821_s5 + $0x90] sm:$0xff]  }
 0x1af   :  { %1515 = vmatprep.subr.bf16.mxu1 %v3181_v37  ;;  %v3678_v37 = vld [vmem:[%s4821_s5 + $0x98] sm:$0xff]  }
 0x1b2   :  { %1516 = vmatpush1.bf16.msra.mxu1 %v3180_v41  ;;  %v3683_v41 = vld [vmem:[%s4821_s5 + $0xe8] sm:$0xff]  }
 0x1b3   :  { %1517 = vmatprep.subr.bf16.mxu1 %v3197_v42  ;;  %v3685_v42 = vld [vmem:[%s4821_s5 + $0xa8] sm:$0xff]  }
 0x1b6   :  { %1518 = vmatpush1.bf16.msra.mxu1 %v3196_v48  ;;  %v3691_v48 = vld [vmem:[%s4821_s5 + $0xf8] sm:$0xff]  }
 0x1b7   :  { %1552 = vmatprep.subr.bf16.mxu1 %v3151_v49  ;;  %v3693_v49 = vld [vmem:[%s4821_s5 + $0xb8] sm:$0xff]  }
 0x1b9   :  { %3208 = vmatmul.mubr.msk.bf16.vlgmr.msra.gmra.mrb[16].mxu1 %vm725_vm1, %v4198_v47 }
 0x1ba   :  { %1553 = vmatpush1.bf16.msra.mxu1 %v3150_v53  ;;  %1584 = vmatprep.mubr.bf16.mxu1 %v3807_v55  ;;  %v4451_v53 = vshrl.u32 %v937_v51, 7  ;;  %v3711_v51 = vld [vmem:[%s4821_s5 + $0x1e0] sm:$0xff]  }
 0x1bb   :  { %1554 = vmatprep.subr.bf16.mxu1 %v3167_v54 }
 0x1bc   :  { %v939_v54 = vsub.s32 0, %v4451_v53  ;;  %v943_v57 = vsub.s32 1, %v4451_v53  ;;  %v947_v5 = vsub.s32 2, %v4451_v53  ;;  %v955_v27 = vsub.s32 4, %v4451_v53 }
 0x1be   :  { %1555 = vmatpush1.bf16.msra.mxu1 %v3166_v58  ;;  %v940_v58 = vrot.slane %v4457_v56, %v939_v54  ;;  %v948_v9 = vrot.slane %v4457_v56, %v947_v5 }
 0x1bf   :  { %1556 = vmatprep.subr.bf16.mxu1 %v3183_v59  ;;  %v944_v59 = vrot.slane %v4457_v56, %v943_v57 }
 0x1c2   :  { %1557 = vmatpush1.bf16.msra.mxu1 %v3182_v52 }
 0x1c3   :  { %1558 = vmatprep.subr.bf16.mxu1 %v3199_v60 }
 0x1c6   :  { %1559 = vmatpush1.bf16.msra.mxu1 %v3198_v63 }
 0x1c7   :  { %1593 = vmatprep.subr.bf16.mxu1 %v3153_v0 }
 0x1c9   :  { %3209 = vmatmul.mubr.msk.bf16.vlgmr.msra.gmra.mrb[20].mxu1 %vm725_vm1, %v4198_v47 }
 0x1ca   :  { %1594 = vmatpush1.bf16.msra.mxu1 %v3152_v3  ;;  %1625 = vmatprep.mubr.bf16.mxu1 %v3807_v55 }
 0x1cb   :  { %1595 = vmatprep.subr.bf16.mxu1 %v3169_v4  ;;  %v3684_v4 = vld [vmem:[%s4821_s5 + $0x148] sm:$0xff]  }
 0x1ce   :  { %1596 = vmatpush1.bf16.msra.mxu1 %v3168_v7  ;;  %v951_v7 = vsub.s32 3, %v4451_v53 }
 0x1cf   :  { %1597 = vmatprep.subr.bf16.mxu1 %v3185_v8  ;;  %v3688_v8 = vld [vmem:[%s4821_s5 + $0x150] sm:$0xff]  }
 0x1d0   :  { %v952_v10 = vrot.slane %v4457_v56, %v951_v7 }
 0x1d2   :  { %1598 = vmatpush1.bf16.msra.mxu1 %v3184_v38  ;;  %v3690_v38 = vld [vmem:[%s4821_s5 + $0x110] sm:$0xff]  }
 0x1d3   :  { %1599 = vmatprep.subr.bf16.mxu1 %v3201_v11  ;;  %v3692_v11 = vld [vmem:[%s4821_s5 + $0x158] sm:$0xff]  }
 0x1d6   :  { %1600 = vmatpush1.bf16.msra.mxu1 %v3200_v34 }
 0x1d7   :  { %1634 = vmatprep.subr.bf16.mxu1 %v3155_v16  ;;  %v3694_v16 = vld [vmem:[%s4821_s5 + $0x118] sm:$0xff]  }
 0x1d9   :  { %3210 = vmatmul.mubr.msk.bf16.vlgmr.msra.gmra.mrb[24].mxu1 %vm725_vm1, %v4198_v47 }
 0x1da   :  { %1635 = vmatpush1.bf16.msra.mxu1 %v3154_v20  ;;  %1666 = vmatprep.mubr.bf16.mxu1 %v3807_v55  ;;  %v3669_v55 = vld [vmem:[%s4821_s5 + $0xc0] sm:$0xff]  }
 0x1db   :  { %1636 = vmatprep.subr.bf16.mxu1 %v3171_v21 }
 0x1de   :  { %1637 = vmatpush1.bf16.msra.mxu1 %v3170_v24 }
 0x1df   :  { %1638 = vmatprep.subr.bf16.mxu1 %v3187_v25  ;;  %v3699_v25 = vld [vmem:[%s4821_s5 + $0x168] sm:$0xff]  }
 0x1e2   :  { %1639 = vmatpush1.bf16.msra.mxu1 %v3186_v28  ;;  %v3701_v28 = vld [vmem:[%s4821_s5 + $0x128] sm:$0xff]  }
 0x1e3   :  { %1640 = vmatprep.subr.bf16.mxu1 %v3203_v29  ;;  %v3702_v29 = vld [vmem:[%s4821_s5 + $0x188] sm:$0xff]  }
 0x1e6   :  { %1641 = vmatpush1.bf16.msra.mxu1 %v3202_v30  ;;  %v959_v30 = vsub.s32 5, %v4451_v53 }
 0x1e7   :  { %3397 = vmatprep.subr.bf16.mxu1 %v3669_v55  ;;  %v3703_v55 = vld [vmem:[%s4821_s5 + $0x170] sm:$0xff]  }
 0x1e9   :  { %3211 = vmatmul.mubr.msk.bf16.vlgmr.msra.gmra.mrb[28].mxu1 %vm725_vm1, %v4198_v47  ;;  %v3676_v47 = vld [vmem:[%s4821_s5 + $0xd8] sm:$0xff]  }
 0x1ea   :  { %3398 = vmatpush3.bf16.msra.mxu1 %v3670_v31  ;;  %v3704_v31 = vld [vmem:[%s4821_s5 + $0x1d0] sm:$0xff]  }
 0x1eb   :  { %3399 = vmatprep.subr.bf16.mxu1 %v3671_v32  ;;  %v956_v32 = vrot.slane %v4457_v56, %v955_v27 }
 0x1ee   :  { %3400 = vmatpush3.bf16.msra.mxu1 %v3672_v33  ;;  %v960_v33 = vrot.slane %v4457_v56, %v959_v30 }
 0x1ef   :  { %3401 = vmatprep.subr.bf16.mxu1 %v3673_v35  ;;  %v3705_v35 = vld [vmem:[%s4821_s5 + $0x130] sm:$0xff]  }
 0x1f2   :  { %3402 = vmatpush3.bf16.msra.mxu1 %v3674_v36  ;;  %v3706_v36 = vld [vmem:[%s4821_s5 + $0x190] sm:$0xff]  }
 0x1f3   :  { %3403 = vmatprep.subr.bf16.mxu1 %v3676_v47  ;;  %v3707_v47 = vld [vmem:[%s4821_s5 + $0x178] sm:$0xff]  }
 0x1f6   :  { %3404 = vmatpush3.bf16.msra.mxu1 %v3678_v37  ;;  %v3708_v37 = vld [vmem:[%s4821_s5 + $0x1d8] sm:$0xff]  }
 0x1f7   :  { %3405 = vmatprep.subr.bf16.mxu1 %v3679_v39 }
 0x1fa   :  { %3406 = vmatpush3.bf16.msra.mxu1 %v3681_v40 }
 0x1fb   :  { %3407 = vmatprep.subr.bf16.mxu1 %v3683_v41 }
 0x1fe   :  { %3408 = vmatpush3.bf16.msra.mxu1 %v3685_v42 }
 0x1ff   :  { %3409 = vmatprep.subr.bf16.mxu1 %v3687_v45 }
 0x202   :  { %3410 = vmatpush3.bf16.msra.mxu1 %v3689_v46  ;;  %v3709_v46 = vld [vmem:[%s4821_s5 + $0x138] sm:$0xff]  }
 0x203   :  { %3411 = vmatprep.subr.bf16.mxu1 %v3691_v48  ;;  %v3710_v48 = vld [vmem:[%s4821_s5 + $0x198] sm:$0xff]  }
 0x206   :  { %3412 = vmatpush3.bf16.msra.mxu1 %v3693_v49 }
 0x207   :  { %3441 = vmatprep.subr.bf16.mxu1 %v3696_v50 }
 0x24c   :  { %v1381_v43 = vpop.f32.mrb[0].mxu1 }
 0x24d   :  { %v1382_v44 = vadd.f32 %v1381_v43, %v940_v58  ;;  %v1383_v52 = vpop.f32.mrb[1].mxu1  ;;  %v3712_v58 = vld [vmem:[%s4821_s5 + $0x240] sm:$0xff]  }
 0x24e   :  { %v1384_v60 = vadd.f32 %v1383_v52, %v944_v59  ;;  %v1385_v61 = vpop.f32.mrb[2].mxu1  ;;  %v3714_v52 = vld [vmem:[%s4821_s5 + $0x200] sm:$0xff]  }
 0x24f   :  { %v1675_v62 = vmax.f32 %v1382_v44, 0.0  ;;  %v1386_v63 = vpop.f32.mrb[3].mxu1  ;;  %v3713_v44 = vld [vmem:[%s4821_s5 + $0x1a0] sm:$0xff]   ;;  %v3715_v61 = vld [vmem:[%s4821_s5 + $0x1e8] sm:$0xff]  }
 0x250   :  { %v1676_v0 = vmax.f32 %v1384_v60, 0.0  ;;  %v963_v63 = vsub.s32 6, %v4451_v53 }
 0x251   :  { %v1691_v3 = vpack.c.bf16 %v1675_v62, %v1675_v62  ;;  %v3716_v62 = vld [vmem:[%s4821_s5 + $0x248] sm:$0xff]  }
 0x252   :  { %v1692_v1 = vpack.c.bf16 %v1676_v0, %v1676_v0  ;;  %v3717_v0 = vld [vmem:[%s4821_s5 + $0x1a8] sm:$0xff]  }
 0x254   :  { %2770 = vmatprep.mubr.bf16.mxu0 %v1692_v1  ;;  %v3718_v1 = vld [vmem:[%s4821_s5 + $0x208] sm:$0xff]  }
 0x255   :  { %2771 = vmatmul.mubr.bf16.vlgmr.msra.gmra.mrb[64].mxu0 %v1691_v3  ;;  %v3719_v3 = vld [vmem:[%s4821_s5 + $0x1f0] sm:$0xff]  }
 0x256   :  { %3420 = vmatpush3.bf16.msra.mxu0 %v3682_v2  ;;  %v967_v2 = vsub.s32 7, %v4451_v53  ;;  %v3782_v53 = vld [vmem:[%s4821_s5 + $0x3b8] sm:$0xff]  }
 0x257   :  { %3421 = vmatprep.subr.bf16.mxu0 %v3684_v4  ;;  %v3720_v4 = vld [vmem:[%s4821_s5 + $0x250] sm:$0xff]  }
 0x25a   :  { %3422 = vmatpush3.bf16.msra.mxu0 %v3686_v6  ;;  %v964_v6 = vrot.slane %v4457_v56, %v963_v63 }
 0x25b   :  { %3423 = vmatprep.subr.bf16.mxu0 %v3688_v8  ;;  %v968_v8 = vrot.slane %v4457_v56, %v967_v2 }
 0x25c   :  { %v1422_v12 = vpop.f32.mrb[4].mxu1 }
 0x25d   :  { %v1423_v13 = vadd.f32 %v1422_v12, %v948_v9  ;;  %v1424_v14 = vpop.f32.mrb[5].mxu1  ;;  %v3721_v9 = vld [vmem:[%s4821_s5 + $0x1b0] sm:$0xff]  }
 0x25e   :  { %v1425_v15 = vadd.f32 %v1424_v14, %v952_v10  ;;  %v1426_v34 = vpop.f32.mrb[6].mxu1  ;;  %3424 = vmatpush3.bf16.msra.mxu0 %v3690_v38  ;;  %v3722_v10 = vld [vmem:[%s4821_s5 + $0x210] sm:$0xff]   ;;  %v3723_v38 = vld [vmem:[%s4821_s5 + $0x1f8] sm:$0xff]  }
 0x25f   :  { %v1677_v17 = vmax.f32 %v1423_v13, 0.0  ;;  %v1427_v18 = vpop.f32.mrb[7].mxu1  ;;  %3425 = vmatprep.subr.bf16.mxu0 %v3692_v11  ;;  %v3724_v11 = vld [vmem:[%s4821_s5 + $0x258] sm:$0xff]  }
 0x260   :  { %v1678_v20 = vmax.f32 %v1425_v15, 0.0  ;;  %v3725_v34 = vld [vmem:[%s4821_s5 + $0x1b8] sm:$0xff]  }
 0x261   :  { %v1693_v24 = vpack.c.bf16 %v1677_v17, %v1677_v17 }
 0x262   :  { %v1694_v21 = vpack.c.bf16 %v1678_v20, %v1678_v20  ;;  %3426 = vmatpush3.bf16.msra.mxu0 %v3694_v16  ;;  %v3726_v16 = vld [vmem:[%s4821_s5 + $0x218] sm:$0xff]   ;;  %v3728_v20 = vld [vmem:[%s4821_s5 + $0x2c0] sm:$0xff]  }
 0x263   :  { %3427 = vmatprep.subr.bf16.mxu0 %v3695_v19  ;;  %v3727_v19 = vld [vmem:[%s4821_s5 + $0x260] sm:$0xff]  }
 0x264   :  { %2810 = vmatprep.mubr.bf16.mxu1 %v1694_v21 }
 0x265   :  { %2811 = vmatmul.mubr.bf16.vlgmr.msra.gmra.mrb[32].mxu1 %v1693_v24  ;;  %v3730_v24 = vld [vmem:[%s4821_s5 + $0x280] sm:$0xff]  }
 0x266   :  { %3428 = vmatpush3.bf16.msra.mxu0 %v3697_v22  ;;  %3442 = vmatpush3.bf16.msra.mxu1 %v3698_v23  ;;  %v3729_v23 = vld [vmem:[%s4821_s5 + $0x220] sm:$0xff]  }
 0x267   :  { %3429 = vmatprep.subr.bf16.mxu0 %v3699_v25  ;;  %3443 = vmatprep.subr.bf16.mxu1 %v3700_v26  ;;  %v3731_v26 = vld [vmem:[%s4821_s5 + $0x268] sm:$0xff]  }
 0x26a   :  { %3430 = vmatpush3.bf16.msra.mxu0 %v3701_v28  ;;  %3444 = vmatpush3.bf16.msra.mxu1 %v3702_v29  ;;  %v3732_v28 = vld [vmem:[%s4821_s5 + $0x2c8] sm:$0xff]  }
 0x26b   :  { %3431 = vmatprep.subr.bf16.mxu0 %v3703_v55  ;;  %3445 = vmatprep.subr.bf16.mxu1 %v3704_v31  ;;  %v3733_v29 = vld [vmem:[%s4821_s5 + $0x228] sm:$0xff]  }
 0x26c   :  { %v1463_v39 = vpop.f32.mrb[8].mxu1  ;;  %v3734_v55 = vld [vmem:[%s4821_s5 + $0x288] sm:$0xff]  }
 0x26d   :  { %v1464_v40 = vadd.f32 %v1463_v39, %v956_v32  ;;  %v1465_v41 = vpop.f32.mrb[9].mxu1  ;;  %v4631_v31 = vld [vmem:[%s4820_s4 + $0x8] sm:$0xff]  ;;  %v3735_v32 = vld [vmem:[%s4821_s5 + $0x270] sm:$0xff]   ;;  %v3740_v39 = vld [vmem:[%s4821_s5 + $0x2d8] sm:$0xff]  }
 0x26e   :  { %v1466_v42 = vadd.f32 %v1465_v41, %v960_v33  ;;  %v1467_v45 = vpop.f32.mrb[10].mxu1  ;;  %3432 = vmatpush3.bf16.msra.mxu0 %v3705_v35  ;;  %3446 = vmatpush3.bf16.msra.mxu1 %v3706_v36  ;;  %v3736_v33 = vld [vmem:[%s4821_s5 + $0x2d0] sm:$0xff]   ;;  %v972_v35 = vrot.slane %v4631_v31, %v939_v54  ;;  %v976_v36 = vrot.slane %v4631_v31, %v943_v57  ;;  %v3739_v54 = vld [vmem:[%s4821_s5 + $0x278] sm:$0xff]  }
 0x26f   :  { %v1679_v49 = vmax.f32 %v1464_v40, 0.0  ;;  %v1468_v50 = vpop.f32.mrb[11].mxu1  ;;  %3433 = vmatprep.subr.bf16.mxu0 %v3707_v47  ;;  %3447 = vmatprep.subr.bf16.mxu1 %v3708_v37  ;;  %v3737_v47 = vld [vmem:[%s4821_s5 + $0x230] sm:$0xff]  }
 0x270   :  { %v1680_v59 = vmax.f32 %v1466_v42, 0.0  ;;  %v3738_v37 = vld [vmem:[%s4821_s5 + $0x290] sm:$0xff]  }
 0x271   :  { %v1695_v60 = vpack.c.bf16 %v1679_v49, %v1679_v49 }
 0x272   :  { %v1696_v43 = vpack.c.bf16 %v1680_v59, %v1680_v59  ;;  %3434 = vmatpush3.bf16.msra.mxu0 %v3709_v46  ;;  %3448 = vmatpush3.bf16.msra.mxu1 %v3710_v48  ;;  %v3741_v46 = vld [vmem:[%s4821_s5 + $0x238] sm:$0xff]  }
 0x273   :  { %3449 = vmatprep.subr.bf16.mxu1 %v3711_v51  ;;  %3463 = vmatprep.subr.bf16.mxu0 %v3712_v58  ;;  %v3742_v48 = vld [vmem:[%s4821_s5 + $0x298] sm:$0xff]   ;;  %v3743_v51 = vld [vmem:[%s4821_s5 + $0x2e0] sm:$0xff]  }
 0x274   :  { %2850 = vmatprep.mubr.bf16.mxu0 %v1696_v43  ;;  %v3744_v58 = vld [vmem:[%s4821_s5 + $0x340] sm:$0xff]  }
 0x275   :  { %2851 = vmatmul.mubr.bf16.vlgmr.msra.gmra.mrb[68].mxu0 %v1695_v60 }
 0x276   :  { %3450 = vmatpush3.bf16.msra.mxu1 %v3713_v44  ;;  %3464 = vmatpush3.bf16.msra.mxu0 %v3714_v52  ;;  %v3745_v44 = vld [vmem:[%s4821_s5 + $0x2a0] sm:$0xff]  }
 0x277   :  { %3451 = vmatprep.subr.bf16.mxu1 %v3715_v61  ;;  %3465 = vmatprep.subr.bf16.mxu0 %v3716_v62  ;;  %v3746_v52 = vld [vmem:[%s4821_s5 + $0x300] sm:$0xff]   ;;  %v3747_v61 = vld [vmem:[%s4821_s5 + $0x2e8] sm:$0xff]  }
 0x278   :  { %v3748_v62 = vld [vmem:[%s4821_s5 + $0x348] sm:$0xff]  }
 0x27a   :  { %3452 = vmatpush3.bf16.msra.mxu1 %v3717_v0  ;;  %3466 = vmatpush3.bf16.msra.mxu0 %v3718_v1  ;;  %v3749_v0 = vld [vmem:[%s4821_s5 + $0x2a8] sm:$0xff]  }
 0x27b   :  { %3453 = vmatprep.subr.bf16.mxu1 %v3719_v3  ;;  %3467 = vmatprep.subr.bf16.mxu0 %v3720_v4  ;;  %v3750_v1 = vld [vmem:[%s4821_s5 + $0x308] sm:$0xff]   ;;  %v3751_v3 = vld [vmem:[%s4821_s5 + $0x2f0] sm:$0xff]  }
 0x27c   :  { %v1504_v12 = vpop.f32.mrb[12].mxu1  ;;  %v3752_v4 = vld [vmem:[%s4821_s5 + $0x350] sm:$0xff]  }
 0x27d   :  { %v1505_v56 = vadd.f32 %v1504_v12, %v964_v6  ;;  %v1506_v13 = vpop.f32.mrb[13].mxu1  ;;  %v980_v6 = vrot.slane %v4631_v31, %v947_v5  ;;  %v3755_v5 = vld [vmem:[%s4821_s5 + $0x2f8] sm:$0xff]  }
 0x27e   :  { %v1507_v14 = vadd.f32 %v1506_v13, %v968_v8  ;;  %v1508_v15 = vpop.f32.mrb[14].mxu1  ;;  %3454 = vmatpush3.bf16.msra.mxu1 %v3721_v9  ;;  %3468 = vmatpush3.bf16.msra.mxu0 %v3722_v10  ;;  %v984_v8 = vrot.slane %v4631_v31, %v951_v7  ;;  %v3753_v9 = vld [vmem:[%s4821_s5 + $0x2b0] sm:$0xff]  }
 0x27f   :  { %v1681_v17 = vmax.f32 %v1505_v56, 0.0  ;;  %v1509_v18 = vpop.f32.mrb[15].mxu1  ;;  %3455 = vmatprep.subr.bf16.mxu1 %v3723_v38  ;;  %3469 = vmatprep.subr.bf16.mxu0 %v3724_v11  ;;  %v3754_v10 = vld [vmem:[%s4821_s5 + $0x310] sm:$0xff]   ;;  %v3756_v38 = vld [vmem:[%s4821_s5 + $0x358] sm:$0xff]  }
 0x280   :  { %v1682_v21 = vmax.f32 %v1507_v14, 0.0  ;;  %v3757_v14 = vld [vmem:[%s4821_s5 + $0x2b8] sm:$0xff]   ;;  %v3760_v18 = vld [vmem:[%s4821_s5 + $0x3c0] sm:$0xff]  }
 0x281   :  { %v1697_v25 = vpack.c.bf16 %v1681_v17, %v1681_v17  ;;  %v3758_v15 = vld [vmem:[%s4821_s5 + $0x318] sm:$0xff]   ;;  %v3759_v17 = vld [vmem:[%s4821_s5 + $0x360] sm:$0xff]  }
 0x282   :  { %v1698_v22 = vpack.c.bf16 %v1682_v21, %v1682_v21  ;;  %3456 = vmatpush3.bf16.msra.mxu1 %v3725_v34  ;;  %3470 = vmatpush3.bf16.msra.mxu0 %v3726_v16  ;;  %v3761_v21 = vld [vmem:[%s4821_s5 + $0x320] sm:$0xff]  }
 0x283   :  { %3471 = vmatprep.subr.bf16.mxu0 %v3727_v19  ;;  %3485 = vmatprep.subr.bf16.mxu1 %v3728_v20 }
 0x284   :  { %2890 = vmatprep.mubr.bf16.mxu1 %v1698_v22  ;;  %v3762_v22 = vld [vmem:[%s4821_s5 + $0x380] sm:$0xff]  }
 0x285   :  { %2891 = vmatmul.mubr.bf16.vlgmr.msra.gmra.mrb[36].mxu1 %v1697_v25  ;;  %v3764_v25 = vld [vmem:[%s4821_s5 + $0x3c8] sm:$0xff]  }
 0x286   :  { %3472 = vmatpush3.bf16.msra.mxu0 %v3729_v23  ;;  %3486 = vmatpush3.bf16.msra.mxu1 %v3730_v24  ;;  %v3763_v24 = vld [vmem:[%s4821_s5 + $0x368] sm:$0xff]  }
 0x287   :  { %3473 = vmatprep.subr.bf16.mxu0 %v3731_v26  ;;  %3487 = vmatprep.subr.bf16.mxu1 %v3732_v28  ;;  %v3765_v26 = vld [vmem:[%s4821_s5 + $0x328] sm:$0xff]  }
 0x288   :  { %v3766_v28 = vld [vmem:[%s4821_s5 + $0x388] sm:$0xff]  }
 0x28a   :  { %3474 = vmatpush3.bf16.msra.mxu0 %v3733_v29  ;;  %3488 = vmatpush3.bf16.msra.mxu1 %v3734_v55  ;;  %v3767_v29 = vld [vmem:[%s4821_s5 + $0x370] sm:$0xff]  }
 0x28b   :  { %3475 = vmatprep.subr.bf16.mxu0 %v3735_v32  ;;  %3489 = vmatprep.subr.bf16.mxu1 %v3736_v33  ;;  %v3768_v55 = vld [vmem:[%s4821_s5 + $0x3d0] sm:$0xff]   ;;  %v988_v32 = vrot.slane %v4631_v31, %v955_v27  ;;  %v992_v33 = vrot.slane %v4631_v31, %v959_v30  ;;  %v3771_v27 = vld [vmem:[%s4821_s5 + $0x378] sm:$0xff]  }
 0x28c   :  { %v1545_v40 = vpop.f32.mrb[16].mxu1 }
 0x28d   :  { %v1546_v57 = vadd.f32 %v1545_v40, %v972_v35  ;;  %v1547_v41 = vpop.f32.mrb[17].mxu1  ;;  %v3769_v35 = vld [vmem:[%s4821_s5 + $0x330] sm:$0xff]  }
 0x28e   :  { %v1548_v42 = vadd.f32 %v1547_v41, %v976_v36  ;;  %v1549_v45 = vpop.f32.mrb[18].mxu1  ;;  %3476 = vmatpush3.bf16.msra.mxu0 %v3737_v47  ;;  %3490 = vmatpush3.bf16.msra.mxu1 %v3738_v37  ;;  %v3770_v36 = vld [vmem:[%s4821_s5 + $0x390] sm:$0xff]   ;;  %v3772_v47 = vld [vmem:[%s4821_s5 + $0x3d8] sm:$0xff]  }
 0x28f   :  { %v1683_v49 = vmax.f32 %v1546_v57, 0.0  ;;  %v1550_v50 = vpop.f32.mrb[19].mxu1  ;;  %3477 = vmatprep.subr.bf16.mxu0 %v3739_v54  ;;  %3491 = vmatprep.subr.bf16.mxu1 %v3740_v39  ;;  %v3773_v57 = vld [vmem:[%s4821_s5 + $0x338] sm:$0xff]  }
 0x290   :  { %v1684_v59 = vmax.f32 %v1548_v42, 0.0  ;;  %v3774_v41 = vld [vmem:[%s4821_s5 + $0x398] sm:$0xff]   ;;  %v3776_v50 = vld [vmem:[%s4821_s5 + $0x3a0] sm:$0xff]  }
 0x291   :  { %v1699_v60 = vpack.c.bf16 %v1683_v49, %v1683_v49 }
 0x292   :  { %v1700_v43 = vpack.c.bf16 %v1684_v59, %v1684_v59  ;;  %3478 = vmatpush3.bf16.msra.mxu0 %v3741_v46  ;;  %3492 = vmatpush3.bf16.msra.mxu1 %v3742_v48  ;;  %v3775_v46 = vld [vmem:[%s4821_s5 + $0x3e0] sm:$0xff]   ;;  %v3778_v59 = vld [vmem:[%s4821_s5 + $0x3a8] sm:$0xff]  }
 0x293   :  { %3493 = vmatprep.subr.bf16.mxu1 %v3743_v51  ;;  %3507 = vmatprep.subr.bf16.mxu0 %v3744_v58  ;;  %v3777_v58 = vld [vmem:[%s4821_s5 + $0x3e8] sm:$0xff]  }
 0x294   :  { %2930 = vmatprep.mubr.bf16.mxu0 %v1700_v43  ;;  %v3779_v43 = vld [vmem:[%s4821_s5 + $0x3f0] sm:$0xff]  }
 0x295   :  { %2931 = vmatmul.mubr.bf16.vlgmr.msra.gmra.mrb[72].mxu0 %v1699_v60  ;;  %v3780_v60 = vld [vmem:[%s4821_s5 + $0x3b0] sm:$0xff]  }
 0x296   :  { %3494 = vmatpush3.bf16.msra.mxu1 %v3745_v44  ;;  %3508 = vmatpush3.bf16.msra.mxu0 %v3746_v52  ;;  %v996_v44 = vrot.slane %v4631_v31, %v963_v63  ;;  %v1000_v52 = vrot.slane %v4631_v31, %v967_v2 }
 0x297   :  { %3495 = vmatprep.subr.bf16.mxu1 %v3747_v61  ;;  %3509 = vmatprep.subr.bf16.mxu0 %v3748_v62  ;;  %v3781_v61 = vld [vmem:[%s4821_s5 + $0x3f8] sm:$0xff]   ;;  %s3808_s5 = smov [#allocation2]  }
 0x29a   :  { %3496 = vmatpush3.bf16.msra.mxu1 %v3749_v0  ;;  %3510 = vmatpush3.bf16.msra.mxu0 %v3750_v1 }
 0x29b   :  { %3497 = vmatprep.subr.bf16.mxu1 %v3751_v3  ;;  %3511 = vmatprep.subr.bf16.mxu0 %v3752_v4 }
 0x29c   :  { %v1586_v11 = vpop.f32.mrb[20].mxu1 }
 0x29d   :  { %v1587_v7 = vadd.f32 %v1586_v11, %v980_v6  ;;  %v1588_v12 = vpop.f32.mrb[21].mxu1 }
 0x29e   :  { %v1589_v56 = vadd.f32 %v1588_v12, %v984_v8  ;;  %v1590_v13 = vpop.f32.mrb[22].mxu1  ;;  %3498 = vmatpush3.bf16.msra.mxu1 %v3753_v9  ;;  %3512 = vmatpush3.bf16.msra.mxu0 %v3754_v10 }
 0x29f   :  { %v1685_v34 = vmax.f32 %v1587_v7, 0.0  ;;  %v1591_v16 = vpop.f32.mrb[23].mxu1  ;;  %3499 = vmatprep.subr.bf16.mxu1 %v3755_v5  ;;  %3513 = vmatprep.subr.bf16.mxu0 %v3756_v38  ;;  %v3212_v7 = vld [vmem:[%s4822_s6] ss:$0 sm:$0xff]  ;;  %s3065_s6 = sshll.u32 %s3808_s5, 4  ;;  %s3066_s6 = int_to_ptr.vmem [resolvable:$true] %s3065_s6 }
 0x2a0   :  { %v1686_v19 = vmax.f32 %v1589_v56, 0.0  ;;  %s3783_s10 = scalar_lea.vmem %s3066_s6, 32  ;;  %p3788_p1 = scmp.lt.s32.totalorder %s3066_s6, %s3066_s6 }
 0x2a1   :  { %v1701_v23 = vpack.c.bf16 %v1685_v34, %v1685_v34  ;;  %p3784_p0 = scmp.ne.s32.totalorder %s3066_s6, %s3783_s10  ;;  %p3789_p2 = scmp.lt.s32.totalorder %s3783_s10, %s3783_s10 }
 0x2a2   :  { %v1702_v20 = vpack.c.bf16 %v1686_v19, %v1686_v19  ;;  %3500 = vmatpush3.bf16.msra.mxu1 %v3757_v14  ;;  %3514 = vmatpush3.bf16.msra.mxu0 %v3758_v15 }
 0x2a3   :  { %3515 = vmatprep.subr.bf16.mxu0 %v3759_v17  ;;  %3529 = vmatprep.subr.bf16.mxu1 %v3760_v18  ;;  %p3790_p3 = por %p3789_p2, %p3788_p1 }
 0x2a4   :  { %2970 = vmatprep.mubr.bf16.mxu1 %v1702_v20 }
 0x2a5   :  { %2971 = vmatmul.mubr.bf16.vlgmr.msra.gmra.mrb[40].mxu1 %v1701_v23  ;;  %p3791_p4 = pnand %p3790_p3, %p3784_p0 }
 0x2a6   :  { %3516 = vmatpush3.bf16.msra.mxu0 %v3761_v21  ;;  %3530 = vmatpush3.bf16.msra.mxu1 %v3762_v22 }
 0x2a7   :  { %3517 = vmatprep.subr.bf16.mxu0 %v3763_v24  ;;  %3531 = vmatprep.subr.bf16.mxu1 %v3764_v25 }
 0x2aa   :  { %3518 = vmatpush3.bf16.msra.mxu0 %v3765_v26  ;;  %3532 = vmatpush3.bf16.msra.mxu1 %v3766_v28 }
 0x2ab   :  { %3519 = vmatprep.subr.bf16.mxu0 %v3767_v29  ;;  %3533 = vmatprep.subr.bf16.mxu1 %v3768_v55 }
 0x2ac   :  { %v1627_v37 = vpop.f32.mrb[24].mxu1 }
 0x2ad   :  { %v1628_v30 = vadd.f32 %v1627_v37, %v988_v32  ;;  %v1629_v54 = vpop.f32.mrb[25].mxu1 }
 0x2ae   :  { %v1630_v39 = vadd.f32 %v1629_v54, %v992_v33  ;;  %v1631_v40 = vpop.f32.mrb[26].mxu1  ;;  %3520 = vmatpush3.bf16.msra.mxu0 %v3769_v35  ;;  %3534 = vmatpush3.bf16.msra.mxu1 %v3770_v36 }
 0x2af   :  { %v1687_v42 = vmax.f32 %v1628_v30, 0.0  ;;  %v1632_v45 = vpop.f32.mrb[27].mxu1  ;;  %3521 = vmatprep.subr.bf16.mxu0 %v3771_v27  ;;  %3535 = vmatprep.subr.bf16.mxu1 %v3772_v47 }
 0x2b0   :  { %v1688_v48 = vmax.f32 %v1630_v39, 0.0 }
 0x2b1   :  { %v1703_v51 = vpack.c.bf16 %v1687_v42, %v1687_v42 }
 0x2b2   :  { %v1704_v49 = vpack.c.bf16 %v1688_v48, %v1688_v48  ;;  %3522 = vmatpush3.bf16.msra.mxu0 %v3773_v57  ;;  %3536 = vmatpush3.bf16.msra.mxu1 %v3774_v41 }
 0x2b3   :  { %3537 = vmatprep.subr.bf16.mxu1 %v3775_v46 }
 0x2b4   :  { %3010 = vmatprep.mubr.bf16.mxu0 %v1704_v49 }
 0x2b5   :  { %3011 = vmatmul.mubr.bf16.vlgmr.msra.gmra.mrb[76].mxu0 %v1703_v51 }
 0x2b6   :  { %3538 = vmatpush3.bf16.msra.mxu1 %v3776_v50 }
 0x2b7   :  { %3539 = vmatprep.subr.bf16.mxu1 %v3777_v58 }
 0x2ba   :  { %3540 = vmatpush3.bf16.msra.mxu1 %v3778_v59 }
 0x2bb   :  { %3541 = vmatprep.subr.bf16.mxu1 %v3779_v43 }
 0x2bc   :  { %v1668_v62 = vpop.f32.mrb[28].mxu1 }
 0x2bd   :  { %v1669_v0 = vadd.f32 %v1668_v62, %v996_v44  ;;  %v1670_v1 = vpop.f32.mrb[29].mxu1 }
 0x2be   :  { %v1671_v3 = vadd.f32 %v1670_v1, %v1000_v52  ;;  %v1672_v4 = vpop.f32.mrb[30].mxu1  ;;  %3542 = vmatpush3.bf16.msra.mxu1 %v3780_v60 }
 0x2bf   :  { %v1689_v63 = vmax.f32 %v1669_v0, 0.0  ;;  %v1673_v2 = vpop.f32.mrb[31].mxu1  ;;  %3543 = vmatprep.subr.bf16.mxu1 %v3781_v61 }
 0x2c0   :  { %v1690_v31 = vmax.f32 %v1671_v3, 0.0 }
 0x2c1   :  { %v1705_v8 = vpack.c.bf16 %v1689_v63, %v1689_v63 }
 0x2c2   :  { %v1706_v6 = vpack.c.bf16 %v1690_v31, %v1690_v31  ;;  %3544 = vmatpush3.bf16.msra.mxu1 %v3782_v53 }
 0x2c4   :  { %3050 = vmatprep.mubr.bf16.mxu1 %v1706_v6 }
 0x2c5   :  { %3051 = vmatmul.mubr.bf16.vlgmr.msra.gmra.mrb[44].mxu1 %v1705_v8 }
 0x328   :  { %v3391_v9 = vpop.f32.mrb[64].mxu0 }
 0x329   :  { %v3392_v10 = vpop.f32.mrb[65].mxu0 }
 0x32a   :  { %v3393_v5 = vadd.f32 %v3392_v10, %v3391_v9  ;;  %v3394_v38 = vpop.f32.mrb[66].mxu0 }
 0x32b   :  { %v3395_v11 = vpop.f32.mrb[67].mxu0 }
 0x32c   :  { %v2773_v13 = vadd.f32 %v3393_v5, %v3212_v7 }
 0x338   :  { %v3413_v12 = vpop.f32.mrb[32].mxu1 }
 0x339   :  { %v3414_v56 = vpop.f32.mrb[33].mxu1 }
 0x33a   :  { %v3415_v14 = vadd.f32 %v3414_v56, %v3413_v12  ;;  %v3416_v15 = vpop.f32.mrb[34].mxu1 }
 0x33b   :  { %v3417_v34 = vpop.f32.mrb[35].mxu1 }
 0x33c   :  { %v2813_v16 = vadd.f32 %v3415_v14, %v2773_v13 }
 0x348   :  { %v3435_v17 = vpop.f32.mrb[68].mxu0 }
 0x349   :  { %v3436_v18 = vpop.f32.mrb[69].mxu0 }
 0x34a   :  { %v3437_v19 = vadd.f32 %v3436_v18, %v3435_v17  ;;  %v3438_v20 = vpop.f32.mrb[70].mxu0 }
 0x34b   :  { %v3439_v21 = vpop.f32.mrb[71].mxu0 }
 0x34c   :  { %v2853_v22 = vadd.f32 %v3437_v19, %v2813_v16 }
 0x358   :  { %v3457_v23 = vpop.f32.mrb[36].mxu1 }
 0x359   :  { %v3458_v24 = vpop.f32.mrb[37].mxu1 }
 0x35a   :  { %v3459_v25 = vadd.f32 %v3458_v24, %v3457_v23  ;;  %v3460_v26 = vpop.f32.mrb[38].mxu1 }
 0x35b   :  { %v3461_v28 = vpop.f32.mrb[39].mxu1 }
 0x35c   :  { %v2893_v29 = vadd.f32 %v3459_v25, %v2853_v22 }
 0x368   :  { %v3479_v55 = vpop.f32.mrb[72].mxu0 }
 0x369   :  { %v3480_v32 = vpop.f32.mrb[73].mxu0 }
 0x36a   :  { %v3481_v33 = vadd.f32 %v3480_v32, %v3479_v55  ;;  %v3482_v35 = vpop.f32.mrb[74].mxu0 }
 0x36b   :  { %v3483_v36 = vpop.f32.mrb[75].mxu0 }
 0x36c   :  { %v2933_v27 = vadd.f32 %v3481_v33, %v2893_v29 }
 0x378   :  { %v3501_v47 = vpop.f32.mrb[40].mxu1 }
 0x379   :  { %v3502_v37 = vpop.f32.mrb[41].mxu1 }
 0x37a   :  { %v3503_v30 = vadd.f32 %v3502_v37, %v3501_v47  ;;  %v3504_v54 = vpop.f32.mrb[42].mxu1 }
 0x37b   :  { %v3505_v39 = vpop.f32.mrb[43].mxu1 }
 0x37c   :  { %v2973_v40 = vadd.f32 %v3503_v30, %v2933_v27 }
 0x388   :  { %v3523_v57 = vpop.f32.mrb[76].mxu0 }
 0x389   :  { %v3524_v41 = vpop.f32.mrb[77].mxu0 }
 0x38a   :  { %v3525_v42 = vadd.f32 %v3524_v41, %v3523_v57  ;;  %v3526_v45 = vpop.f32.mrb[78].mxu0 }
 0x38b   :  { %v3527_v46 = vpop.f32.mrb[79].mxu0 }
 0x38c   :  { %v3013_v48 = vadd.f32 %v3525_v42, %v2973_v40 }
 0x398   :  { %v3545_v49 = vpop.f32.mrb[44].mxu1 }
 0x399   :  { %v3546_v50 = vpop.f32.mrb[45].mxu1 }
 0x39a   :  { %v3547_v51 = vadd.f32 %v3546_v50, %v3545_v49  ;;  %v3548_v58 = vpop.f32.mrb[46].mxu1 }
 0x39b   :  { %v3549_v59 = vpop.f32.mrb[47].mxu1 }
 0x39c   :  { %v3053_v43 = vadd.f32 %v3547_v51, %v3013_v48 }
 0x39e   :  { %3058 = vst [vmem:[#allocation2] sm:$0x3] %v3053_v43 }
 0x39f   :  { %3794 = shalt.err (!%p3791_p4)
}
 0x3a0   :  { %s3795_s12 = scalar_lea.hbm %s4823_s7, 32 }
 0x3a1   :  { %p3796_p5 = scmp.ne.s32.totalorder %s4823_s7, %s3795_s12  ;;  %p3799_p6 = scmp.lt.u32.totalorder %s3795_s12, %s4823_s7 }
 0x3a3   :  { %p3801_p7 = pnand %p3799_p6, %p3796_p5 }
 0x3a5   :  { %3804 = shalt.err (!%p3801_p7)
}
 0x3a6   :  { %3068 = dma.vmem_to_hbm [thread:$0]  %s3066_s6, 32, %s4823_s7, [#allocation3]  }
 0x3a7   :  { %3805 = dma.done.wait [#allocation3], 32  }
 0x3a8   :  { %3806 = vsyncadd [#allocation3], 4294967264 }
 0x3a9   :  { %3072 = vsyncpa [#allocation3], 1 }

</bundles_post_ra>
